<compile_context>
chip_gen: v6e
topology: v6e:2x2x1
jax: 0.10.0
libtpu: 0.0.40
codegen_flags: <defaults>
</compile_context>

<pallas_src>
import functools

import jax
import jax.numpy as jnp
from jax import lax
from jax.experimental import pallas as pl
from jax.experimental.pallas import tpu as pltpu


def _round_up(x, m):
    return ((x + m - 1) // m) * m


def _loss_kernel(pred_ref, tgt_ref, out_ref, cross_ref, inv_ref, *, n, tn):
    # pred_ref/tgt_ref: (1, tn, N) input-dtype   out_ref: (1, 1, 1) f32
    # cross_ref: (1, N)             accumulated column sums of pred*target
    # inv_ref:   (n_panels*tn, 1)   per-row 1/(||pred_row|| * ||target_row||)
    p_idx = pl.program_id(1)
    n_panels = pl.num_programs(1)
    ragged = (n % tn) != 0                     # static Python bool

    # In-kernel upcast: inputs stream at native width (bf16/fp16/f32).
    p = pred_ref[0].astype(jnp.float32)        # (tn, N)
    t = tgt_ref[0].astype(jnp.float32)         # (tn, N)

    @pl.when(p_idx == 0)
    def _():
        cross_ref[...] = jnp.zeros_like(cross_ref)

    row0 = pl.multiple_of(p_idx * tn, tn)

    if ragged:
        ridx = lax.broadcasted_iota(jnp.int32, (tn, 1), 0)
        row_valid = (row0 + ridx) < n          # (tn, 1) mask of real rows
    else:
        row_valid = None

    # Row L2 norms: rows are complete within a panel.  rsqrt -> EUP slot.
    rs_p = jnp.sum(p * p, axis=1, keepdims=True)       # (tn, 1)
    rs_t = jnp.sum(t * t, axis=1, keepdims=True)       # (tn, 1)
    inv_panel = lax.rsqrt(rs_p) * lax.rsqrt(rs_t)      # no_pr * no_gt per row
    if ragged:
        # Pad rows contain garbage -> force their inv to 0 (avoids inf/NaN
        # reaching the finalize dot).
        inv_panel = jnp.where(row_valid, inv_panel, 0.0)
    inv_ref[pl.ds(row0, tn), :] = inv_panel

    # Column sums of pred*target: partial over this panel's rows; accumulate.
    pt = p * t
    if ragged:
        pt = jnp.where(row_valid, pt, 0.0)             # pad rows contribute 0
    cross_ref[...] += jnp.sum(pt, axis=0, keepdims=True)   # (1, N)

    @pl.when(p_idx == n_panels - 1)
    def _():
        # losses[b] = -sum_j cross[j] * inv[j].  The (1,N)@(N,1) dot also
        # reconciles the lane-oriented cross with the sublane-oriented inv.
        inv_n = inv_ref[pl.ds(0, n), :]                 # drop pad rows
        loss = lax.dot_general(
            cross_ref[...], inv_n,
            dimension_numbers=(((1,), (0,)), ((), ())),
            precision=lax.Precision.HIGHEST,
            preferred_element_type=jnp.float32)         # (1, 1)
        out_ref[0] = (-loss).astype(out_ref.dtype)


def _default_row_panel(n):
    """Fixed row-panel size, per-generation; never depends on divisibility."""
    tn = 256                                   # fits default scoped VMEM on v5e/v6e
    try:
        kind = jax.devices()[0].device_kind.lower()
        if "v7" in kind or "7x" in kind:
            tn = 512                           # amortize per-step overhead on v7x
    except Exception:
        pass
    return max(16, min(tn, _round_up(n, 16)))


def loss_kernel_matching_perpixel(pred, target, *, row_panel=None):
    """pred, target: (bs, N, N).  Returns the scalar loss of the module."""
    bs, n, n2 = pred.shape
    assert n == n2 and target.shape == pred.shape, "expected square (bs, N, N) kernels"

    tn = row_panel if row_panel is not None else _default_row_panel(n)
    assert tn % 8 == 0, "row_panel must be a multiple of 8 (16 recommended for bf16)"
    n_panels = pl.cdiv(n, tn)
    n_pad_rows = n_panels * tn                 # inv scratch padded so stores stay in-bounds

    # Explicit VMEM budget: 2 inputs x 2 pipeline buffers x (tn, lane-padded N)
    # at native input width, plus the two resident accumulators.
    lane_pad = _round_up(n, 128)
    in_bytes = 2 * tn * lane_pad * (pred.dtype.itemsize + target.dtype.itemsize)
    scratch_bytes = 8 * lane_pad * 4 + n_pad_rows * 128 * 4
    vmem_limit = int(min(max(1.25 * (in_bytes + scratch_bytes) + (2 << 20),
                             32 << 20), 112 << 20))

    kernel = functools.partial(_loss_kernel, n=n, tn=tn)
    per_batch = pl.pallas_call(
        kernel,
        out_shape=jax.ShapeDtypeStruct((bs, 1, 1), jnp.float32),
        grid_spec=pltpu.PrefetchScalarGridSpec(
            num_scalar_prefetch=0,
            grid=(bs, n_panels),
            in_specs=[
                pl.BlockSpec((1, tn, n), lambda b, p: (b, p, 0)),
                pl.BlockSpec((1, tn, n), lambda b, p: (b, p, 0)),
            ],
            out_specs=pl.BlockSpec((1, 1, 1), lambda b, p: (b, 0, 0)),
            scratch_shapes=[
                pltpu.VMEM((1, n), jnp.float32),           # column sums of pred*target
                pltpu.VMEM((n_pad_rows, 1), jnp.float32),  # per-row inverse norm products
            ],
        ),
        compiler_params=pltpu.CompilerParams(
            dimension_semantics=("parallel", "arbitrary"),
            vmem_limit_bytes=vmem_limit),
    )(pred, target)

    losses = per_batch[:, 0, 0]
    # `losses.sum() / bs / 1681` — 1681 (= 41*41) is hard-coded in the module.
    return jnp.sum(losses) / bs / 1681.0


def loss_reference(pred, target):
    """Pure-JAX mirror of the PyTorch forward, for verification."""
    pred = pred.astype(jnp.float32)
    target = target.astype(jnp.float32)
    bs = pred.shape[0]
    no_pr = 1.0 / jnp.sqrt(jnp.sum(pred * pred, axis=2))       # (bs, N)
    no_gt = 1.0 / jnp.sqrt(jnp.sum(target * target, axis=2))   # (bs, N)
    scaled_pr = pred * no_pr[:, None, :]      # pred[l] @ diag(no_pr): scale cols
    scaled_gt = target * no_gt[:, None, :]
    losses = -jnp.sum(scaled_pr * scaled_gt, axis=(1, 2))      # (bs,)
    return jnp.sum(losses) / bs / 1681.0


if __name__ == "__main__":
    # Small test shapes.  N = 200 is deliberately NOT a multiple of the row
    # panel (ragged last panel) nor of 128 (lane padding), mirroring the
    # production N = 41*41 = 1681 structure.
    bs, n = 2, 200

    key = jax.random.PRNGKey(0)
    k1, k2 = jax.random.split(key)
    pred = jax.random.normal(k1, (bs, n, n), dtype=jnp.float32)
    target = jax.random.normal(k2, (bs, n, n), dtype=jnp.float32)

    # f32 inputs, explicit small panel: 4 panels/batch, last one ragged (8 valid rows).
    out = loss_kernel_matching_perpixel(pred, target, row_panel=64)
    out = jax.block_until_ready(out)
    ref = loss_reference(pred, target)
    assert out.shape == ()
    assert jnp.allclose(out, ref, rtol=1e-3, atol=2e-6), (out, ref)

    # bf16 inputs: the f32 upcast happens inside the kernel (native-width DMA).
    pred_bf = pred.astype(jnp.bfloat16)
    target_bf = target.astype(jnp.bfloat16)
    out_bf = jax.block_until_ready(
        loss_kernel_matching_perpixel(pred_bf, target_bf, row_panel=64))
    ref_bf = loss_reference(pred_bf, target_bf)
    assert jnp.allclose(out_bf, ref_bf, rtol=5e-3, atol=1e-5), (out_bf, ref_bf)

    # Default (per-device) panel size, non-ragged path.
    out2 = jax.block_until_ready(
        loss_kernel_matching_perpixel(pred[:, :128, :128], target[:, :128, :128]))
    ref2 = loss_reference(pred[:, :128, :128], target[:, :128, :128])
    assert jnp.allclose(out2, ref2, rtol=1e-3, atol=2e-6), (out2, ref2)

    print("KERNEL_OK")
</pallas_src>

<mosaic_0001>
module attributes {stable_mosaic.version = 11 : i64} {
  func.func @_loss_kernel(%arg0: i32, %arg1: i32, %arg2: memref<1x64x200xf32, #tpu.memory_space<vmem>>, %arg3: memref<1x64x200xf32, #tpu.memory_space<vmem>>, %arg4: memref<1x1x1xf32, #tpu.memory_space<vmem>>, %arg5: memref<1x200xf32, #tpu.memory_space<vmem>>, %arg6: memref<256x1xf32, #tpu.memory_space<vmem>>) attributes {dimension_semantics = [#tpu.dimension_semantics<parallel>, #tpu.dimension_semantics<arbitrary>], iteration_bounds = array<i64: 2, 4>, scalar_prefetch = 0 : i64, scratch_operands = 2 : i64, tpu.core_type = #tpu.core_type<tc>, window_params = [{transform_indices = @transform_0, window_bounds = array<i64: 1, 64, 200>}, {transform_indices = @transform_1, window_bounds = array<i64: 1, 64, 200>}, {transform_indices = @transform_2, window_bounds = array<i64: 1, 1, 1>}]} {
    %c0 = arith.constant 0 : index
    %c0_0 = arith.constant 0 : index
    %c0_1 = arith.constant 0 : index
    %0 = vector.load %arg2[%c0, %c0_0, %c0_1] : memref<1x64x200xf32, #tpu.memory_space<vmem>>, vector<1x64x200xf32>
    %1 = vector.shape_cast %0 : vector<1x64x200xf32> to vector<64x200xf32>
    %c0_2 = arith.constant 0 : index
    %c0_3 = arith.constant 0 : index
    %c0_4 = arith.constant 0 : index
    %2 = vector.load %arg3[%c0_2, %c0_3, %c0_4] : memref<1x64x200xf32, #tpu.memory_space<vmem>>, vector<1x64x200xf32>
    %3 = vector.shape_cast %2 : vector<1x64x200xf32> to vector<64x200xf32>
    %c0_i32 = arith.constant 0 : i32
    %4 = arith.cmpi eq, %arg1, %c0_i32 : i32
    %5 = arith.extui %4 : i1 to i32
    %c0_i32_5 = arith.constant 0 : i32
    %6 = arith.cmpi ne, %5, %c0_i32_5 : i32
    scf.if %6 {
      %cst_16 = arith.constant 0.000000e+00 : f32
      %40 = vector.broadcast %cst_16 : f32 to vector<1x200xf32>
      %c0_17 = arith.constant 0 : index
      %c0_18 = arith.constant 0 : index
      %41 = vector.load %arg5[%c0_17, %c0_18] : memref<1x200xf32, #tpu.memory_space<vmem>>, vector<1x200xf32>
      tpu.vector_store %arg5[%c0_17, %c0_18], %40 {strides = array<i32>} : memref<1x200xf32, #tpu.memory_space<vmem>>, vector<1x200xf32>,
    } else {
    }
    %c64_i32 = arith.constant 64 : i32
    %7 = arith.muli %arg1, %c64_i32 : i32
    %8 = tpu.assume_multiple %7, 64 : i32
    %9 = tpu.iota {dimensions = array<i32: 0>} : vector<64x1xi32>
    %10 = vector.broadcast %8 : i32 to vector<64x1xi32>
    %11 = arith.addi %10, %9 : vector<64x1xi32>
    %c200_i32 = arith.constant 200 : i32
    %12 = vector.broadcast %c200_i32 : i32 to vector<64x1xi32>
    %13 = arith.cmpi slt, %11, %12 : vector<64x1xi32>
    %14 = arith.mulf %1, %1 : vector<64x200xf32>
    %cst = arith.constant dense<0.000000e+00> : vector<64xf32>
    %15 = vector.multi_reduction <add>, %14, %cst [1] : vector<64x200xf32> to vector<64xf32>
    %16 = vector.shape_cast %15 : vector<64xf32> to vector<64x1xf32>
    %17 = arith.mulf %3, %3 : vector<64x200xf32>
    %cst_6 = arith.constant dense<0.000000e+00> : vector<64xf32>
    %18 = vector.multi_reduction <add>, %17, %cst_6 [1] : vector<64x200xf32> to vector<64xf32>
    %19 = vector.shape_cast %18 : vector<64xf32> to vector<64x1xf32>
    %20 = math.rsqrt %16 : vector<64x1xf32>
    %21 = math.rsqrt %19 : vector<64x1xf32>
    %22 = arith.mulf %20, %21 : vector<64x1xf32>
    %cst_7 = arith.constant 0.000000e+00 : f32
    %23 = vector.broadcast %cst_7 : f32 to vector<64x1xf32>
    %24 = arith.select %13, %22, %23 : vector<64x1xi1>, vector<64x1xf32>
    %25 = arith.index_cast %8 : i32 to index
    %c0_8 = arith.constant 0 : index
    %26 = vector.load %arg6[%25, %c0_8] : memref<256x1xf32, #tpu.memory_space<vmem>>, vector<64x1xf32>
    tpu.vector_store %arg6[%25, %c0_8], %24 {strides = array<i32>} : memref<256x1xf32, #tpu.memory_space<vmem>>, vector<64x1xf32>,
    %27 = arith.mulf %1, %3 : vector<64x200xf32>
    %cst_9 = arith.constant 0.000000e+00 : f32
    %28 = vector.shape_cast %13 : vector<64x1xi1> to vector<64x1xi1>
    %29 = vector.broadcast %28 : vector<64x1xi1> to vector<64x200xi1>
    %30 = vector.broadcast %cst_9 : f32 to vector<64x200xf32>
    %31 = arith.select %29, %27, %30 : vector<64x200xi1>, vector<64x200xf32>
    %c0_10 = arith.constant 0 : index
    %c0_11 = arith.constant 0 : index
    %32 = vector.load %arg5[%c0_10, %c0_11] : memref<1x200xf32, #tpu.memory_space<vmem>>, vector<1x200xf32>
    %cst_12 = arith.constant dense<0.000000e+00> : vector<200xf32>
    %33 = vector.multi_reduction <add>, %31, %cst_12 [0] : vector<64x200xf32> to vector<200xf32>
    %34 = vector.shape_cast %33 : vector<200xf32> to vector<1x200xf32>
    %35 = arith.addf %32, %34 : vector<1x200xf32>
    %c0_13 = arith.constant 0 : index
    %c0_14 = arith.constant 0 : index
    %36 = vector.load %arg5[%c0_13, %c0_14] : memref<1x200xf32, #tpu.memory_space<vmem>>, vector<1x200xf32>
    tpu.vector_store %arg5[%c0_13, %c0_14], %35 {strides = array<i32>} : memref<1x200xf32, #tpu.memory_space<vmem>>, vector<1x200xf32>,
    %c3_i32 = arith.constant 3 : i32
    %37 = arith.cmpi eq, %arg1, %c3_i32 : i32
    %38 = arith.extui %37 : i1 to i32
    %c0_i32_15 = arith.constant 0 : i32
    %39 = arith.cmpi ne, %38, %c0_i32_15 : i32
    scf.if %39 {
      %c0_16 = arith.constant 0 : index
      %c0_17 = arith.constant 0 : index
      %40 = vector.load %arg6[%c0_16, %c0_17] : memref<256x1xf32, #tpu.memory_space<vmem>>, vector<200x1xf32>
      %c0_18 = arith.constant 0 : index
      %c0_19 = arith.constant 0 : index
      %41 = vector.load %arg5[%c0_18, %c0_19] : memref<1x200xf32, #tpu.memory_space<vmem>>, vector<1x200xf32>
      %cst_20 = arith.constant dense<0.000000e+00> : vector<1x1xf32>
      %42 = tpu.matmul %41, %40, %cst_20 {dimension_numbers = #tpu.dot_dimension_numbers<[1], [0], [0], [1], [0, 0, 1, 1], [], []>, precision = #tpu.contract_precision<fp32>} : vector<1x200xf32>, vector<200x1xf32>, vector<1x1xf32> -> vector<1x1xf32>
      %cst_21 = arith.constant 0.000000e+00 : f32
      %43 = vector.broadcast %cst_21 : f32 to vector<1x1xf32>
      %44 = arith.subf %43, %42 : vector<1x1xf32>
      %c0_22 = arith.constant 0 : index
      %c0_23 = arith.constant 0 : index
      %c0_24 = arith.constant 0 : index
      %45 = vector.load %arg4[%c0_22, %c0_23, %c0_24] : memref<1x1x1xf32, #tpu.memory_space<vmem>>, vector<1x1x1xf32>
      %46 = vector.shape_cast %45 : vector<1x1x1xf32> to vector<1x1xf32>
      %47 = vector.shape_cast %44 : vector<1x1xf32> to vector<1x1x1xf32>
      tpu.vector_store %arg4[%c0_22, %c0_23, %c0_24], %47 {strides = array<i32>} : memref<1x1x1xf32, #tpu.memory_space<vmem>>, vector<1x1x1xf32>,
    } else {
    }
    return
  }
  func.func @transform_0(%arg0: i32, %arg1: i32) -> (i32, i32, i32) {
    %c0_i32 = arith.constant 0 : i32
    %c0_i32_0 = arith.constant 0 : i32
    return %arg0, %arg1, %c0_i32 : i32, i32, i32
  }
  func.func @transform_1(%arg0: i32, %arg1: i32) -> (i32, i32, i32) {
    %c0_i32 = arith.constant 0 : i32
    %c0_i32_0 = arith.constant 0 : i32
    return %arg0, %arg1, %c0_i32 : i32, i32, i32
  }
  func.func @transform_2(%arg0: i32, %arg1: i32) -> (i32, i32, i32) {
    %c0_i32 = arith.constant 0 : i32
    %c0_i32_0 = arith.constant 0 : i32
    %c0_i32_1 = arith.constant 0 : i32
    return %arg0, %c0_i32, %c0_i32_0 : i32, i32, i32
  }
}

</mosaic_0001>

<bundles_post_ra>
// kernel: tpu_custom_call.1
= control target key start
LH: loop header
LB: loop body
LE: loop exit
PB: predicated region body
PF: predicated region fallthrough
CT: control target
= control target key end

     0   :  { %7 = vsyncpa [#allocation5], 0  ;;  %s2833_s0 = inlined_call_operand.hbm [shape: f32[2,200,200], index: 0, kind: input, shape index: {}]   ;;  %s2834_s1 = inlined_call_operand.hbm [shape: f32[2,200,200], index: 1, kind: input, shape index: {}]   ;;  %s2835_s2 = inlined_call_operand.vmem [shape: f32[2,1,1], index: 2, kind: output, shape index: {}]  }
   0x1   :  { %9 = vsyncpa [#allocation5 + $0x1], 0 }
   0x2   :  { %10 = vsyncpa [#allocation7], 0 }
   0x3   :  { %12 = vsyncpa [#allocation7 + $0x1], 0  ;;  %s1768_s9 = smov 0   ;;  %s1770_s10 = smov 0  }
   0x4   :  { %s1772_s11 = smov 0   ;;  %s1774_s12 = smov 0  }
   0x5   :  { %s1776_s13 = smov 0   ;;  %s1778_s14 = smov 0  }
   0x6   :  { %s1780_s15 = smov 0   ;;  %s1782_s16 = smov 0  }
   0x7 LB: > { %s27_s17 = sadd.s32 1, %s1734_s14  ;;  %s30_s18 = sadd.s32 1, %s1738_s15  ;;  %s1742_s16 = sphi %s1782_s16, %s18_s16   ;;  %s1738_s15 = sphi %s1780_s15, %s2910_s15   ;;  %s1734_s14 = sphi %s1778_s14, %s2909_s14   ;;  %s1730_s13 = sphi %s1776_s13, %s2908_s13   ;;  %s1726_s12 = sphi %s1774_s12, %s2907_s12   ;;  %s1722_s11 = sphi %s1772_s11, %s2906_s11   ;;  %s1718_s10 = sphi %s1770_s10, %s2905_s10   ;;  %s1714_s9 = sphi %s1768_s9, %s2904_s9  }
   0x8   : > { %p28_p0 = scmp.ge.s32.totalorder %s27_s17, 4  ;;  %s1479_s19 = sadd.s32 4294967295, %s1742_s16  }
   0x9   : > { %p46_p1 = scmp.ne.s32.totalorder %s1722_s11, %s1718_s10  ;;  %p47_p2 = scmp.eq.s32.totalorder %s1742_s16, 0 }
   0xa   : > { %s2912_s17 = smov (%p28_p0, %s27_s17), 0  ;;  %s2914_s18 = smov (!%p28_p0, %s30_s18), %s1738_s15 }
   0xb   : > { %s35_s20 = ssub.s32 %s1734_s14, %s2912_s17  ;;  %p32_p3 = scmp.ge.s32.totalorder %s2914_s18, 2 }
   0xc   : > { %p52_p4 = scmp.ne.s32.totalorder %s1718_s10, %s1714_s9  ;;  %p1818_p5 = por %p47_p2, %p46_p1 }
   0xd   : > { %p53_p6 = scmp.eq.s32.totalorder %s1479_s19, 0  ;;  %s2916_s18 = smov (%p32_p3, %s2914_s18), 0 }
   0xe   : > { %s34_s23 = ssub.s32 %s1738_s15, %s2916_s18  ;;  %s39_s25 = sadd.s32 1, %s1722_s11 }
   0xf   : > { %p1824_p7 = por %p53_p6, %p52_p4  ;;  %s36_s24 = sor.u32 %s35_s20, %s34_s23 }
  0x10   : > { %p37_p8 = scmp.eq.s32.totalorder %s36_s24, 0  ;;  %p1482_p9 = scmp.ge.s32.totalorder %s1742_s16, 8 }
  0x12   : > { %s1832_s26 = scalar_select %p37_p8, %s1722_s11, %s39_s25  }
  0x13   : > { %126 = sbr.rel (%p1482_p9) target bundleno = 96 (0x60), region = 16 }
  0x18   : > { %129 = sbr.rel (!%p1818_p5) target bundleno = 60 (0x3c), region = 20  ;;  %s130_s27 = sand.u32 (%p1818_p5), 1, %s1722_s11  }
  0x19   : > { %s1484_s28 = sshll.u32 (%p1818_p5), %s1734_s14, 3  ;;  %s1483_s29 = sshll.u32 (%p1818_p5), %s130_s27, 7 }
  0x1a   : > { %s136_s30 = ssub.s32 (%p1818_p5), 25, %s1484_s28  ;;  %s1842_s5 = scalar_lea.sflag (%p1818_p5), [#allocation5], %s130_s27 }
  0x1b   : > { %p137_p10 = scmp.lt.s32.totalorder (%p1818_p5), %s136_s30, 8  ;;  %s134_s6 = scalar_lea.vmem (%p1818_p5), [#allocation4], %s1483_s29 }
  0x1d   : > { %s2918_s30 = smov (!%p137_p10, %s136_s30), 8 }
  0x1e   : > { %s1839_s3 = sshll.u32 %s2918_s30, 8 }
  0x1f   : > { %s142_s4 = ssub.s32 2048, %s1839_s3 }
  0x20   : > { %143 = vsyncadd %s1842_s5, %s142_s4  ;;  %p1487_p11 = scmp.ne.s32.totalorder %s1839_s3, 0  ;;  %s1510_s7 = sshll.u32 %s1734_s14, 4 }
  0x21   : > { %s1513_s8 = smul.u32 50, %s1738_s15  ;;  %s151_s9 = sshll.u32 %s134_s6, 4  ;;  %s1848_s9 = int_to_ptr.vmem [resolvable:$true] %s151_s9 }
  0x22   : > { %s1624_s30 = scalar_lea.hbm %s2833_s0, 12800 }
  0x23   : > { %s147_s19 = sadd.s32 %s1513_s8, %s1510_s7 }
  0x24   : > { %s1489_s20 = sshll.u32 %s147_s19, 7 }
  0x25   : > { %s1853_s25 = scalar_lea.hbm %s2833_s0, %s1489_s20 }
  0x26   : > { %s1620_s27 = scalar_lea.hbm %s1853_s25, %s1839_s3 }
  0x27   : > { %p1621_p12 = scmp.ne.s32.totalorder %s1853_s25, %s1620_s27  ;;  %p1626_p1 = scmp.lt.s32.totalorder %s1624_s30, %s1620_s27 }
  0x29   : > { %p1622_p13 = pnand %p1621_p12, %p1487_p11 }
  0x2b   : > { %p1623_p0 = pneg %p1622_p13 }
  0x2d   : > { %p1628_p2 = pnand %p1626_p1, %p1623_p0 }
  0x2f   : > { %1631 = shalt.err (!%p1628_p2)
}
  0x30   : > { %s1632_s4 = scalar_lea.vmem %s1848_s9, %s1839_s3  ;;  %s1744_s6 = smov [#allocation4]  }
  0x31   : > { %p1633_p3 = scmp.ne.s32.totalorder %s1848_s9, %s1632_s4  ;;  %s1636_s7 = sshll.u32 %s1744_s6, 4  ;;  %s1637_s7 = int_to_ptr.vmem [resolvable:$false] %s1636_s7 }
  0x32   : > { %s1638_s8 = scalar_lea.vmem %s1637_s7, 4096  ;;  %p1639_p8 = scmp.lt.s32.totalorder %s1848_s9, %s1637_s7 }
  0x33   : > { %p1634_p4 = pnand %p1633_p3, %p1487_p11  ;;  %p1640_p9 = scmp.lt.s32.totalorder %s1638_s8, %s1632_s4 }
  0x35   : > { %p1635_p6 = pneg %p1634_p4  ;;  %p1641_p10 = por %p1640_p9, %p1639_p8 }
  0x37   : > { %p1642_p12 = pnand %p1641_p10, %p1635_p6 }
  0x39   : > { %1645 = shalt.err (!%p1642_p12)
}
  0x3a   : > { %s1745_s19 = smov 256   ;;  %s1746_s20 = smov 16  }
  0x3b   : > { %157 = dma.hbm_to_vmem [thread:$0]  (%p1487_p11), %s1853_s25, %s1839_s3, %s1848_s9, %s1842_s5, %s1745_s19, %s1745_s19, %s1746_s20  }
  0x3c PF: > { %160 = sbr.rel (!%p1818_p5) target bundleno = 96 (0x60), region = 24  ;;  %s161_s23 = sand.u32 (%p1818_p5), 1, %s1722_s11  }
  0x3d   : > { %s1493_s24 = sshll.u32 (%p1818_p5), %s1734_s14, 3  ;;  %s1492_s27 = sshll.u32 (%p1818_p5), %s161_s23, 7 }
  0x3e   : > { %s167_s28 = ssub.s32 (%p1818_p5), 25, %s1493_s24  ;;  %s1882_s4 = scalar_lea.sflag (%p1818_p5), [#allocation7], %s161_s23 }
  0x3f   : > { %p168_p13 = scmp.lt.s32.totalorder (%p1818_p5), %s167_s28, 8  ;;  %s165_s3 = scalar_lea.vmem (%p1818_p5), [#allocation6], %s1492_s27 }
  0x41   : > { %s2920_s28 = smov (!%p168_p13, %s167_s28), 8 }
  0x42   : > { %s1879_s29 = sshll.u32 %s2920_s28, 8 }
  0x43   : > { %s173_s30 = ssub.s32 2048, %s1879_s29 }
  0x44   : > { %174 = vsyncadd %s1882_s4, %s173_s30  ;;  %p1496_p5 = scmp.ne.s32.totalorder %s1879_s29, 0  ;;  %s1512_s21 = sshll.u32 %s1734_s14, 4 }
  0x45   : > { %s1514_s5 = smul.u32 50, %s1738_s15  ;;  %s182_s9 = sshll.u32 %s165_s3, 4  ;;  %s1888_s9 = int_to_ptr.vmem [resolvable:$true] %s182_s9 }
  0x46   : > { %s1650_s27 = scalar_lea.hbm %s2834_s1, 12800 }
  0x47   : > { %s178_s25 = sadd.s32 %s1514_s5, %s1512_s21 }
  0x48   : > { %s1498_s6 = sshll.u32 %s178_s25, 7 }
  0x49   : > { %s1893_s19 = scalar_lea.hbm %s2834_s1, %s1498_s6 }
  0x4a   : > { %s1646_s20 = scalar_lea.hbm %s1893_s19, %s1879_s29 }
  0x4b   : > { %p1647_p11 = scmp.ne.s32.totalorder %s1893_s19, %s1646_s20  ;;  %p1652_p2 = scmp.lt.s32.totalorder %s1650_s27, %s1646_s20 }
  0x4d   : > { %p1648_p0 = pnand %p1647_p11, %p1496_p5 }
  0x4f   : > { %p1649_p1 = pneg %p1648_p0 }
  0x51   : > { %p1654_p3 = pnand %p1652_p2, %p1649_p1 }
  0x53   : > { %1657 = shalt.err (!%p1654_p3)
}
  0x54   : > { %s1658_s28 = scalar_lea.vmem %s1888_s9, %s1879_s29  ;;  %s1747_s30 = smov [#allocation6]  }
  0x55   : > { %p1659_p4 = scmp.ne.s32.totalorder %s1888_s9, %s1658_s28  ;;  %s1662_s3 = sshll.u32 %s1747_s30, 4  ;;  %s1663_s3 = int_to_ptr.vmem [resolvable:$false] %s1662_s3 }
  0x56   : > { %s1664_s21 = scalar_lea.vmem %s1663_s3, 4096  ;;  %p1665_p9 = scmp.lt.s32.totalorder %s1888_s9, %s1663_s3 }
  0x57   : > { %p1660_p6 = pnand %p1659_p4, %p1496_p5  ;;  %p1666_p10 = scmp.lt.s32.totalorder %s1664_s21, %s1658_s28 }
  0x59   : > { %p1661_p8 = pneg %p1660_p6  ;;  %p1667_p12 = por %p1666_p10, %p1665_p9 }
  0x5b   : > { %p1668_p13 = pnand %p1667_p12, %p1661_p8 }
  0x5d   : > { %1671 = shalt.err (!%p1668_p13)
}
  0x5e   : > { %s1748_s5 = smov 256   ;;  %s1749_s25 = smov 16  }
  0x5f   : > { %188 = dma.hbm_to_vmem [thread:$0]  (%p1496_p5), %s1893_s19, %s1879_s29, %s1888_s9, %s1882_s4, %s1748_s5, %s1748_s5, %s1749_s25  }
  0x60 PF: > { %p1501_p11 = scmp.ge.s32.totalorder %s1742_s16, 1  ;;  %p190_p0 = scmp.lt.s32.totalorder %s1742_s16, 9 }
  0x62   : > { %p191_p1 = pnand %p1501_p11, %p190_p0 }
  0x63   : > { %s196_s6 = sand.u32 (!%p191_p1), 1, %s1718_s10  }
  0x64   : > { %194 = sbr.rel (%p191_p1) target bundleno = 682 (0x2aa), region = 28  ;;  %s1502_s7 = sshll.u32 (!%p191_p1), %s196_s6, 7 }
  0x65   : > { %s197_s8 = scalar_lea.sflag (!%p191_p1), [#allocation5], %s196_s6  ;;  %s200_s20 = scalar_lea.vmem (!%p191_p1), [#allocation4], %s1502_s7 }
  0x69   : > { %1705 = dma.done.wait (%p1824_p7), %s197_s8, 2048  }
  0x6a   : > { %1707 = vsyncadd (%p1824_p7), %s197_s8, 4294965248  ;;  %s206_s29 = scalar_lea.sflag [#allocation7], %s196_s6  ;;  %s1922_s4 = scalar_lea.vmem [#allocation6], %s1502_s7 }
  0x6b   : > { %1709 = dma.done.wait (%p1824_p7), %s206_s29, 2048  }
  0x6c   : > { %1711 = vsyncadd (%p1824_p7), %s206_s29, 4294965248  ;;  %p245_p5 = scmp.lt.s32.totalorder %s1730_s13, 1  ;;  %v1936_v0 = vld [vmem:[%s200_s20] sm:$0xff]  ;;  %v1938_v1 = vld [vmem:[%s200_s20 + $0x8] sm:$0xff]  ;;  %p1504_p7 = scmp.ne.s32.totalorder %s1726_s12, 0 }
  0x6d   : > { %v1940_v2 = vld [vmem:[%s200_s20 + $0x10] sm:$0xff]  ;;  %v1942_v3 = vld [vmem:[%s200_s20 + $0x18] sm:$0xff]  ;;  %v1944_v4 = vld [vmem:[%s200_s20 + $0x20] sm:$0xff] }
  0x6e   : > { %s2922_s13 = smov (!%p245_p5, %s1730_s13), 1  ;;  %v1946_v5 = vld [vmem:[%s200_s20 + $0x28] sm:$0xff]  ;;  %v1948_v6 = vld [vmem:[%s200_s20 + $0x30] sm:$0xff]  ;;  %v1950_v7 = vld [vmem:[%s200_s20 + $0x38] sm:$0xff] }
  0x6f   : > { %s247_s23 = scalar_lea.vmem %s2835_s2, %s2922_s13  ;;  %v1952_v8 = vld [vmem:[%s200_s20 + $0x40] sm:$0xff]  ;;  %v1954_v9 = vld [vmem:[%s200_s20 + $0x48] sm:$0xff]  ;;  %v1956_v10 = vld [vmem:[%s200_s20 + $0x50] sm:$0xff] }
  0x70   : > { %v1958_v11 = vld [vmem:[%s200_s20 + $0x58] sm:$0xff]  ;;  %v1960_v12 = vld [vmem:[%s200_s20 + $0x60] sm:$0xff]  ;;  %v1962_v13 = vld [vmem:[%s200_s20 + $0x68] sm:$0xff] }
  0x71   : > { %v1964_v14 = vld [vmem:[%s200_s20 + $0x70] sm:$0xff]  ;;  %v1966_v15 = vld [vmem:[%s200_s20 + $0x78] sm:$0xff]  ;;  %v1969_v16 = vld [vmem:[%s1922_s4] sm:$0xff] }
  0x72   : > { %v1972_v17 = vld [vmem:[%s1922_s4 + $0x8] sm:$0xff]  ;;  %v1975_v18 = vld [vmem:[%s1922_s4 + $0x10] sm:$0xff]  ;;  %v1978_v19 = vld [vmem:[%s1922_s4 + $0x18] sm:$0xff]  ;;  %283 = sbr.rel (%p1504_p7) target bundleno = 123 (0x7b), region = 40 }
  0x73   : > { %v1981_v20 = vld [vmem:[%s1922_s4 + $0x20] sm:$0xff]  ;;  %v1984_v21 = vld [vmem:[%s1922_s4 + $0x28] sm:$0xff]  ;;  %v1987_v22 = vld [vmem:[%s1922_s4 + $0x30] sm:$0xff] }
  0x74   : > { %v1990_v23 = vld [vmem:[%s1922_s4 + $0x38] sm:$0xff]  ;;  %v1993_v24 = vld [vmem:[%s1922_s4 + $0x40] sm:$0xff]  ;;  %v1996_v25 = vld [vmem:[%s1922_s4 + $0x48] sm:$0xff] }
  0x75   : > { %v1999_v26 = vld [vmem:[%s1922_s4 + $0x50] sm:$0xff]  ;;  %v2002_v27 = vld [vmem:[%s1922_s4 + $0x58] sm:$0xff]  ;;  %v2005_v28 = vld [vmem:[%s1922_s4 + $0x60] sm:$0xff] }
  0x76   : > { %v2008_v29 = vld [vmem:[%s1922_s4 + $0x68] sm:$0xff]  ;;  %v2011_v30 = vld [vmem:[%s1922_s4 + $0x70] sm:$0xff]  ;;  %v2014_v31 = vld [vmem:[%s1922_s4 + $0x78] sm:$0xff] }
  0x77   : > { %v284_v32 = vlaneseq  ;;  %v1750_v33 = vmov 0.0  }
  0x79   : > { %vm286_vm0 = vcmp.lt.s32.totalorder %v284_v32, 200 }
  0x7a   : > { %288 = vst.msk [vmem:[#allocation2] sm:$0x3] %vm286_vm0, %v1750_v33 }
  0x7b PF: > { %v320_v34 = vmul.f32 %v1944_v4, %v1944_v4  ;;  %v321_v35 = vmul.f32 %v1946_v5, %v1946_v5  ;;  %vm332_vm1 = vcmask 588800   ;;  %v316_v36 = vmul.f32 %v1936_v0, %v1936_v0  ;;  %s1505_s22 = sshll.u32 %s1726_s12, 6  ;;  %p1506_p2 = scmp.ne.s32.totalorder %s1726_s12, 3 }
  0x7c   : > { %v317_v37 = vmul.f32 %v1938_v1, %v1938_v1  ;;  %v322_v38 = vmul.f32 %v1948_v6, %v1948_v6  ;;  %v323_v39 = vmul.f32 %v1950_v7, %v1950_v7  ;;  %v318_v41 = vmul.f32 %v1940_v2, %v1940_v2  ;;  %s445_s24 = scalar_lea.vmem [#allocation3], %s1505_s22 }
  0x7d   : > { %v341_v40 = vsel %vm332_vm1, %v321_v35, 0.0  ;;  %v319_v42 = vmul.f32 %v1942_v3, %v1942_v3  ;;  %v327_v43 = vmul.f32 %v1958_v11, %v1958_v11  ;;  %v326_v50 = vmul.f32 %v1956_v10, %v1956_v10 }
  0x7e   : > { %v342_v44 = vadd.f32 %v341_v40, %v320_v34  ;;  %v333_v45 = vsel %vm332_vm1, %v317_v37, 0.0  ;;  %v345_v46 = vsel %vm332_vm1, %v323_v39, 0.0  ;;  %v325_v51 = vmul.f32 %v1954_v9, %v1954_v9 }
  0x7f   : > { %v334_v47 = vadd.f32 %v333_v45, %v316_v36  ;;  %v337_v48 = vsel %vm332_vm1, %v319_v42, 0.0  ;;  %v346_v49 = vadd.f32 %v345_v46, %v322_v38  ;;  %v353_v53 = vsel %vm332_vm1, %v327_v43, 0.0 }
  0x80   : > { %343 = vadd.xlane.f32.xlu1 %v342_v44  ;;  %v338_v52 = vadd.f32 %v337_v48, %v318_v41  ;;  %v324_v54 = vmul.f32 %v1952_v8, %v1952_v8  ;;  %v331_v55 = vmul.f32 %v1966_v15, %v1966_v15  ;;  %v349_v56 = vsel %vm332_vm1, %v325_v51, 0.0 }
  0x81   : > { %335 = vadd.xlane.f32.xlu0 %v334_v47  ;;  %v329_v57 = vmul.f32 %v1962_v13, %v1962_v13  ;;  %v354_v58 = vadd.f32 %v353_v53, %v326_v50  ;;  %v330_v59 = vmul.f32 %v1964_v14, %v1964_v14  ;;  %v368_v60 = vmul.f32 %v1978_v19, %v1978_v19 }
  0x82   : > { %v366_v61 = vmul.f32 %v1972_v17, %v1972_v17  ;;  %v350_v62 = vadd.f32 %v349_v56, %v324_v54  ;;  %v361_v63 = vsel %vm332_vm1, %v331_v55, 0.0  ;;  %v328_v32 = vmul.f32 %v1960_v12, %v1960_v12 }
  0x83   : > { %v357_v33 = vsel %vm332_vm1, %v329_v57, 0.0  ;;  %v367_v34 = vmul.f32 %v1975_v18, %v1975_v18  ;;  %v365_v35 = vmul.f32 %v1969_v16, %v1969_v16  ;;  %v362_v36 = vadd.f32 %v361_v63, %v330_v59 }
  0x84   : > { %347 = vadd.xlane.f32.xlu1 %v346_v49  ;;  %v385_v37 = vsel %vm332_vm1, %v368_v60, 0.0  ;;  %v381_v38 = vsel %vm332_vm1, %v366_v61, 0.0  ;;  %v372_v39 = vmul.f32 %v1990_v23, %v1990_v23  ;;  %v358_v40 = vadd.f32 %v357_v33, %v328_v32 }
  0x85   : > { %339 = vadd.xlane.f32.xlu0 %v338_v52  ;;  %v370_v41 = vmul.f32 %v1984_v21, %v1984_v21  ;;  %v376_v42 = vmul.f32 %v2002_v27, %v2002_v27  ;;  %v371_v43 = vmul.f32 %v1987_v22, %v1987_v22  ;;  %v374_v44 = vmul.f32 %v1996_v25, %v1996_v25 }
  0x86   : > { %v386_v45 = vadd.f32 %v385_v37, %v367_v34  ;;  %v382_v46 = vadd.f32 %v381_v38, %v365_v35  ;;  %v380_v47 = vmul.f32 %v2014_v31, %v2014_v31  ;;  %v290_v48 = vlaneseq }
  0x87   : > { %v393_v49 = vsel %vm332_vm1, %v372_v39, 0.0  ;;  %v369_v50 = vmul.f32 %v1981_v20, %v1981_v20  ;;  %v375_v51 = vmul.f32 %v1999_v26, %v1999_v26  ;;  %v373_v52 = vmul.f32 %v1993_v24, %v1993_v24 }
  0x88   : > { %355 = vadd.xlane.f32.xlu1 %v354_v58  ;;  %v389_v53 = vsel %vm332_vm1, %v370_v41, 0.0  ;;  %v401_v54 = vsel %vm332_vm1, %v376_v42, 0.0  ;;  %v378_v55 = vmul.f32 %v2008_v29, %v2008_v29  ;;  %v2091_v56 = vshrl.u32 %v290_v48, 7 }
  0x89   : > { %351 = vadd.xlane.f32.xlu0 %v350_v62  ;;  %v397_v57 = vsel %vm332_vm1, %v374_v44, 0.0  ;;  %v379_v58 = vmul.f32 %v2011_v30, %v2011_v30  ;;  %v394_v59 = vadd.f32 %v393_v49, %v371_v43  ;;  %v409_v60 = vsel %vm332_vm1, %v380_v47, 0.0 }
  0x8a   : > { %v292_v61 = vadd.s32 8, %v2091_v56  ;;  %v390_v62 = vadd.f32 %v389_v53, %v369_v50  ;;  %v402_v63 = vadd.f32 %v401_v54, %v375_v51  ;;  %v377_v32 = vmul.f32 %v2005_v28, %v2005_v28 }
  0x8b   : > { %v2103_v33 = vstv %s1505_s22  ;;  %v398_v34 = vadd.f32 %v397_v57, %v373_v52  ;;  %v405_v35 = vsel %vm332_vm1, %v378_v55, 0.0  ;;  %v410_v38 = vadd.f32 %v409_v60, %v379_v58 }
  0x8c   : > { %363 = vadd.xlane.f32.xlu1 %v362_v36  ;;  %v2107_v36 = vadd.s32 %v2103_v33, %v292_v61  ;;  %v2111_v37 = vadd.s32 %v2103_v33, %v2091_v56  ;;  %v458_v39 = vmul.f32 %v1978_v19, %v1942_v3  ;;  %v293_v41 = vadd.s32 16, %v2091_v56 }
  0x8d   : > { %359 = vadd.xlane.f32.xlu0 %v358_v40  ;;  %v456_v40 = vmul.f32 %v1972_v17, %v1938_v1  ;;  %v457_v42 = vmul.f32 %v1975_v18, %v1940_v2  ;;  %v455_v43 = vmul.f32 %v1969_v16, %v1936_v0  ;;  %v406_v44 = vadd.f32 %v405_v35, %v377_v32 }
  0x8e   : > { %vm309_vm2 = vcmp.lt.s32.totalorder %v2107_v36, 200  ;;  %vm308_vm3 = vcmp.lt.s32.totalorder %v2111_v37, 200  ;;  %v294_v17 = vadd.s32 24, %v2091_v56  ;;  %v460_v47 = vmul.f32 %v1984_v21, %v1946_v5 }
  0x8f   : > { %v490_v3 = vsel %vm309_vm2, %v458_v39, 0.0  ;;  %v488_v1 = vsel %vm308_vm3, %v456_v40, 0.0  ;;  %v489_v2 = vsel %vm309_vm2, %v457_v42, 0.0  ;;  %v487_v0 = vsel %vm308_vm3, %v455_v43, 0.0 }
  0x90   : > { %387 = vadd.xlane.f32.xlu1 %v386_v45  ;;  %v518_v18 = vsel %vm332_vm1, %v490_v3, 0.0  ;;  %v517_v16 = vsel %vm332_vm1, %v488_v1, 0.0  ;;  %v504_v19 = vadd.f32 %v489_v2, %v487_v0  ;;  %v462_v45 = vmul.f32 %v1990_v23, %v1950_v7 }
  0x91   : > { %383 = vadd.xlane.f32.xlu0 %v382_v46  ;;  %v2138_v46 = vadd.s32 %v2103_v33, %v294_v17  ;;  %v519_v49 = vadd.f32 %v518_v18, %v517_v16  ;;  %v461_v50 = vmul.f32 %v1987_v22, %v1948_v6  ;;  %v459_v51 = vmul.f32 %v1981_v20, %v1944_v4 }
  0x92   : > { %v2147_v52 = vadd.s32 %v2103_v33, %v293_v41  ;;  %v296_v7 = vadd.s32 40, %v2091_v56  ;;  %v464_v23 = vmul.f32 %v1996_v25, %v1954_v9  ;;  %v295_v5 = vadd.s32 32, %v2091_v56 }
  0x93   : > { %vm311_vm4 = vcmp.lt.s32.totalorder %v2138_v46, 200  ;;  %v463_v20 = vmul.f32 %v1993_v24, %v1952_v8  ;;  %v466_v25 = vmul.f32 %v2002_v27, %v1958_v11  ;;  %v465_v55 = vmul.f32 %v1999_v26, %v1956_v10 }
  0x94   : > { %395 = vadd.xlane.f32.xlu1 %v394_v59  ;;  %v493_v6 = vsel %vm311_vm4, %v461_v50, 0.0  ;;  %v494_v4 = vsel %vm311_vm4, %v462_v45, 0.0  ;;  %vm310_vm5 = vcmp.lt.s32.totalorder %v2147_v52, 200  ;;  %v2172_v57 = vadd.s32 %v2103_v33, %v296_v7 }
  0x95   : > { %391 = vadd.xlane.f32.xlu0 %v390_v62  ;;  %v522_v21 = vsel %vm332_vm1, %v494_v4, 0.0  ;;  %v491_v22 = vsel %vm310_vm5, %v459_v51, 0.0  ;;  %v492_v9 = vsel %vm310_vm5, %v460_v47, 0.0  ;;  %v2175_v24 = vadd.s32 %v2103_v33, %v295_v5 }
  0x96   : > { %v505_v53 = vadd.f32 %v504_v19, %v491_v22  ;;  %v520_v54 = vsel %vm332_vm1, %v492_v9, 0.0  ;;  %v298_v58 = vadd.s32 56, %v2091_v56  ;;  %v468_v59 = vmul.f32 %v2008_v29, %v1962_v13 }
  0x97   : > { %v521_v8 = vadd.f32 %v520_v54, %v519_v49  ;;  %vm313_vm6 = vcmp.lt.s32.totalorder %v2172_v57, 200  ;;  %v467_v10 = vmul.f32 %v2005_v28, %v1960_v12  ;;  %v297_v26 = vadd.s32 48, %v2091_v56 }
  0x98   : > { %403 = vadd.xlane.f32.xlu1 %v402_v63  ;;  %v506_v11 = vadd.f32 %v505_v53, %v493_v6  ;;  %v497_v27 = vsel %vm313_vm6, %v465_v55, 0.0  ;;  %v498_v60 = vsel %vm313_vm6, %v466_v25, 0.0  ;;  %vm312_vm7 = vcmp.lt.s32.totalorder %v2175_v24, 200 }
  0x99   : > { %399 = vadd.xlane.f32.xlu0 %v398_v34  ;;  %v523_v61 = vadd.f32 %v522_v21, %v521_v8  ;;  %v526_v13 = vsel %vm332_vm1, %v498_v60, 0.0  ;;  %v495_v29 = vsel %vm312_vm7, %v463_v20, 0.0  ;;  %v496_v62 = vsel %vm312_vm7, %v464_v23, 0.0  ;;  %v503_v21 = vld [vmem:[#allocation2] sm:$0x3] }
  0x9a   : > { %v469_v12 = vmul.f32 %v2011_v30, %v1964_v14  ;;  %v507_v28 = vadd.f32 %v506_v11, %v495_v29  ;;  %v524_v63 = vsel %vm332_vm1, %v496_v62, 0.0  ;;  %v470_v32 = vmul.f32 %v2014_v31, %v1966_v15 }
  0x9b   : > { %v2200_v34 = vadd.s32 %v2103_v33, %v298_v58  ;;  %v525_v35 = vadd.f32 %v524_v63, %v523_v61  ;;  %v1751_v18 = vmov 1966171168   ;;  %vm559_vm10 = vcmp.lt.s32.totalorder %v290_v48, 200 }
  0x9c   : > { %411 = vadd.xlane.f32.xlu1 %v410_v38  ;;  %v2203_v38 = vadd.s32 %v2103_v33, %v297_v26  ;;  %v508_v39 = vadd.f32 %v507_v28, %v497_v27  ;;  %v542_v0 = vunpack.c.l.s4 %v1751_v18  ;;  %vm446_vm11 = vcmask 7168  }
  0x9d   : > { %407 = vadd.xlane.f32.xlu0 %v406_v44  ;;  %vm315_vm8 = vcmp.lt.s32.totalorder %v2200_v34, 200  ;;  %v527_v14 = vadd.f32 %v526_v13, %v525_v35 }
  0x9e   : > { %v502_v40 = vsel %vm315_vm8, %v470_v32, 0.0  ;;  %vm314_vm9 = vcmp.lt.s32.totalorder %v2203_v38, 200  ;;  %v501_v30 = vsel %vm315_vm8, %v469_v12, 0.0  ;;  %v543_v49 = vunpack.c.0.s8 %v542_v0 }
  0x9f   : > { %v499_v15 = vsel %vm314_vm9, %v467_v10, 0.0  ;;  %v500_v31 = vsel %vm314_vm9, %v468_v59, 0.0  ;;  %v530_v33 = vsel %vm332_vm1, %v502_v40, 0.0 }
  0xa0   : > { %v509_v41 = vadd.f32 %v508_v39, %v499_v15  ;;  %v528_v42 = vsel %vm332_vm1, %v500_v31, 0.0  ;;  %v546_v6 = vsub.s32 %v543_v49, %v2091_v56 }
  0xa1   : > { %v529_v43 = vadd.f32 %v528_v42, %v527_v14 }
  0xa2   : > { %v510_v44 = vadd.f32 %v509_v41, %v501_v30 }
  0xa3   : > { %v531_v3 = vadd.f32 %v530_v33, %v529_v43 }
  0xa4   : > { %v511_v1 = vrot.slane %v510_v44, 4 }
  0xa5   : > { %v532_v17 = vrot.slane %v531_v3, 4 }
  0xa6   : > { %v512_v2 = vadd.f32 %v511_v1, %v510_v44 }
  0xa7   : > { %v533_v16 = vadd.f32 %v532_v17, %v531_v3 }
  0xa8   : > { %v513_v19 = vrot.slane %v512_v2, 2 }
  0xa9   : > { %v534_v45 = vrot.slane %v533_v16, 2 }
  0xaa   : > { %v514_v47 = vadd.f32 %v513_v19, %v512_v2 }
  0xab   : > { %v535_v50 = vadd.f32 %v534_v45, %v533_v16 }
  0xac   : > { %v515_v51 = vrot.slane %v514_v47, 1 }
  0xad   : > { %v536_v7 = vrot.slane %v535_v50, 1 }
  0xae   : > { %v516_v23 = vadd.f32 %v515_v51, %v514_v47 }
  0xaf   : > { %v537_v5 = vadd.f32 %v536_v7, %v535_v50 }
  0xb1   : > { %v540_v4 = vcombine.low %v516_v23, %v537_v5 }
  0xb3   : > { %v547_v20 = vrot.slane %v540_v4, %v546_v6 }
  0xb5   : > { %v554_v22 = vrot.slane %v547_v20, %v546_v6 }
  0xb7   : > { %v556_v9 = vadd.f32 %v554_v22, %v503_v21 }
  0xb9   : > { %561 = vst.msk [vmem:[#allocation2] sm:$0x3] %vm559_vm10, %v556_v9 }
 0x109   : > { %v344_v25 = vpop.xlane.xlu1 %343 }
 0x10a   : > { %v336_v53 = vpop.xlane.xlu0 %335 }
 0x10b   : > { %1588 = vrsqrt.f32 %v336_v53 }
 0x10d   : > { %v348_v54 = vpop.xlane.xlu1 %347 }
 0x10e   : > { %v340_v55 = vpop.xlane.xlu0 %339 }
 0x10f   : > { %1590 = vrsqrt.f32 %v340_v55 }
 0x111   : > { %v356_v8 = vpop.xlane.xlu1 %355 }
 0x112   : > { %v352_v58 = vpop.xlane.xlu0 %351 }
 0x115   : > { %v364_v59 = vpop.xlane.xlu1 %363 }
 0x116   : > { %v360_v11 = vpop.xlane.xlu0 %359 }
 0x118   : > { %v1589_v13 = vpop.eup %1588 }
 0x119   : > { %v388_v10 = vpop.xlane.xlu1 %387 }
 0x11a   : > { %1592 = vrsqrt.f32 %v388_v10  ;;  %v384_v26 = vpop.xlane.xlu0 %383 }
 0x11b   : > { %1594 = vrsqrt.f32 %v384_v26 }
 0x11c   : > { %1596 = vrsqrt.f32 %v344_v25  ;;  %v1591_v62 = vpop.eup %1590 }
 0x11d   : > { %1598 = vrsqrt.f32 %v348_v54  ;;  %v396_v27 = vpop.xlane.xlu1 %395 }
 0x11e   : > { %1600 = vrsqrt.f32 %v396_v27  ;;  %v392_v48 = vpop.xlane.xlu0 %391 }
 0x11f   : > { %1602 = vrsqrt.f32 %v392_v48 }
 0x120   : > { %1604 = vrsqrt.f32 %v356_v8 }
 0x121   : > { %1606 = vrsqrt.f32 %v352_v58  ;;  %v404_v60 = vpop.xlane.xlu1 %403 }
 0x122   : > { %1608 = vrsqrt.f32 %v404_v60  ;;  %v400_v61 = vpop.xlane.xlu0 %399 }
 0x123   : > { %1610 = vrsqrt.f32 %v400_v61 }
 0x124   : > { %1612 = vrsqrt.f32 %v364_v59 }
 0x125   : > { %1614 = vrsqrt.f32 %v360_v11  ;;  %v412_v29 = vpop.xlane.xlu1 %411 }
 0x126   : > { %1616 = vrsqrt.f32 %v412_v29  ;;  %v408_v12 = vpop.xlane.xlu0 %407 }
 0x127   : > { %v1593_v28 = vpop.eup %1592  ;;  %1618 = vrsqrt.f32 %v408_v12 }
 0x128   : > { %v1595_v63 = vpop.eup %1594  ;;  %v430_v32 = vmul.f32 %v1593_v28, %v1591_v62 }
 0x129   : > { %v1597_v35 = vpop.eup %1596  ;;  %v429_v39 = vmul.f32 %v1595_v63, %v1589_v13 }
 0x12a   : > { %v1599_v40 = vpop.eup %1598  ;;  %v438_v14 = vsel %vm309_vm2, %v430_v32, 0.0 }
 0x12b   : > { %v1601_v30 = vpop.eup %1600  ;;  %448 = vst.msk [vmem:[%s445_s24 + $0x8] sm:$0xff] %vm446_vm11, %v438_v14  ;;  %v437_v15 = vsel %vm308_vm3, %v429_v39, 0.0 }
 0x12c   : > { %v1603_v31 = vpop.eup %1602  ;;  %447 = vst.msk [vmem:[%s445_s24] sm:$0xff] %vm446_vm11, %v437_v15  ;;  %v432_v33 = vmul.f32 %v1601_v30, %v1599_v40 }
 0x12d   : > { %v1605_v41 = vpop.eup %1604  ;;  %v431_v42 = vmul.f32 %v1603_v31, %v1597_v35 }
 0x12e   : > { %v1607_v43 = vpop.eup %1606  ;;  %v440_v44 = vsel %vm311_vm4, %v432_v33, 0.0 }
 0x12f   : > { %v1609_v36 = vpop.eup %1608  ;;  %450 = vst.msk [vmem:[%s445_s24 + $0x18] sm:$0xff] %vm446_vm11, %v440_v44  ;;  %v439_v3 = vsel %vm310_vm5, %v431_v42, 0.0 }
 0x130   : > { %v1611_v1 = vpop.eup %1610  ;;  %449 = vst.msk [vmem:[%s445_s24 + $0x10] sm:$0xff] %vm446_vm11, %v439_v3  ;;  %v434_v37 = vmul.f32 %v1609_v36, %v1605_v41 }
 0x131   : > { %v1613_v17 = vpop.eup %1612  ;;  %v433_v2 = vmul.f32 %v1611_v1, %v1607_v43 }
 0x132   : > { %v1615_v18 = vpop.eup %1614  ;;  %v442_v0 = vsel %vm313_vm6, %v434_v37, 0.0 }
 0x133   : > { %v1617_v16 = vpop.eup %1616  ;;  %452 = vst.msk [vmem:[%s445_s24 + $0x28] sm:$0xff] %vm446_vm11, %v442_v0  ;;  %v441_v46 = vsel %vm312_vm7, %v433_v2, 0.0 }
 0x134   : > { %v1619_v19 = vpop.eup %1618  ;;  %451 = vst.msk [vmem:[%s445_s24 + $0x20] sm:$0xff] %vm446_vm11, %v441_v46  ;;  %v436_v52 = vmul.f32 %v1617_v16, %v1613_v17  ;;  %565 = sbr.rel (%p1506_p2) target bundleno = 682 (0x2aa), region = 44 }
 0x135   : > { %v435_v45 = vmul.f32 %v1619_v19, %v1615_v18 }
 0x136   : > { %v444_v47 = vsel %vm315_vm8, %v436_v52, 0.0 }
 0x137   : > { %454 = vst.msk [vmem:[%s445_s24 + $0x38] sm:$0xff] %vm446_vm11, %v444_v47  ;;  %v443_v57 = vsel %vm314_vm9, %v435_v45, 0.0 }
 0x138   : > { %453 = vst.msk [vmem:[%s445_s24 + $0x30] sm:$0xff] %vm446_vm11, %v443_v57 }
 0x139   : > { %v1752_v51 = vmov 0.0   ;;  %vm1376_vm12 = vcmask 0  }
 0x13a   : > { %604 = vmatprep.subr.mxu0 %v1752_v51  ;;  %709 = vmatprep.subr.mxu1 %v1752_v51 }
 0x13f   : > { %v581_v24 = vld [vmem:[#allocation3 + $0x78] sm:$0xff]  ;;  %v580_v49 = vld [vmem:[#allocation3 + $0x70] sm:$0xff]  ;;  %v579_v50 = vld [vmem:[#allocation3 + $0x68] sm:$0xff] }
 0x140   : > { %v2247_v7 = vand.u32 4294901760, %v581_v24  ;;  %v2249_v34 = vand.u32 4294901760, %v580_v49  ;;  %v2251_v23 = vand.u32 4294901760, %v579_v50  ;;  %v578_v5 = vld [vmem:[#allocation3 + $0x60] sm:$0xff]  ;;  %v577_v38 = vld [vmem:[#allocation3 + $0x58] sm:$0xff]  ;;  %v576_v6 = vld [vmem:[#allocation3 + $0x50] sm:$0xff] }
 0x141   : > { %v2254_v4 = vand.u32 4294901760, %v578_v5  ;;  %v2256_v20 = vand.u32 4294901760, %v577_v38  ;;  %v2258_v21 = vand.u32 4294901760, %v576_v6  ;;  %v575_v22 = vld [vmem:[#allocation3 + $0x48] sm:$0xff]  ;;  %v574_v9 = vld [vmem:[#allocation3 + $0x40] sm:$0xff]  ;;  %v573_v8 = vld [vmem:[#allocation3 + $0x38] sm:$0xff] }
 0x142   : > { %606 = vmatpush1.msra.mxu0 %v2247_v7  ;;  %v2262_v25 = vsub.f32 %v581_v24, %v2247_v7  ;;  %v2265_v53 = vsub.f32 %v580_v49, %v2249_v34  ;;  %v2267_v54 = vand.u32 4294901760, %v575_v22  ;;  %v2270_v55 = vsub.f32 %v579_v50, %v2251_v23  ;;  %v572_v48 = vld [vmem:[#allocation3 + $0x30] sm:$0xff]  ;;  %v571_v35 = vld [vmem:[#allocation3 + $0x28] sm:$0xff]  ;;  %v570_v15 = vld [vmem:[#allocation3 + $0x20] sm:$0xff] }
 0x143   : > { %607 = vmatprep.subr.mxu0 %v1752_v51  ;;  %v2274_v58 = vsub.f32 %v578_v5, %v2254_v4  ;;  %v2277_v59 = vsub.f32 %v577_v38, %v2256_v20  ;;  %v2283_v27 = vand.u32 4294901760, %v574_v9  ;;  %v2287_v61 = vand.u32 4294901760, %v573_v8  ;;  %v569_v3 = vld [vmem:[#allocation3 + $0x18] sm:$0xff]  ;;  %v568_v2 = vld [vmem:[#allocation3 + $0x10] sm:$0xff]  ;;  %v567_v52 = vld [vmem:[#allocation3 + $0x8] sm:$0xff] }
 0x144   : > { %609 = vmatpush1.msra.mxu0 %v2249_v34  ;;  %v2852_v11 = vand.u32 4294901760, %v2262_v25  ;;  %v2850_v10 = vand.u32 4294901760, %v2265_v53  ;;  %v2849_v26 = vand.u32 4294901760, %v2270_v55  ;;  %v2291_v29 = vsub.f32 %v576_v6, %v2258_v21  ;;  %v566_v38 = vld [vmem:[#allocation3] sm:$0xff] }
 0x145   : > { %610 = vmatprep.subr.mxu0 %v1752_v51  ;;  %v2848_v60 = vand.u32 4294901760, %v2274_v58  ;;  %v2847_v13 = vand.u32 4294901760, %v2277_v59  ;;  %v2304_v63 = vsub.f32 %v575_v22, %v2267_v54  ;;  %v2307_v32 = vand.u32 4294901760, %v572_v48 }
 0x146   : > { %612 = vmatpush1.msra.mxu0 %v2251_v23  ;;  %v713_v62 = vsub.f32 %v2262_v25, %v2852_v11  ;;  %v720_v12 = vsub.f32 %v2265_v53, %v2850_v10  ;;  %v727_v28 = vsub.f32 %v2270_v55, %v2849_v26  ;;  %v2845_v30 = vand.u32 4294901760, %v2291_v29 }
 0x147   : > { %613 = vmatprep.subr.mxu0 %v1752_v51  ;;  %v734_v14 = vsub.f32 %v2274_v58, %v2848_v60  ;;  %v741_v31 = vsub.f32 %v2277_v59, %v2847_v13  ;;  %v2319_v33 = vsub.f32 %v574_v9, %v2283_v27  ;;  %v2322_v42 = vand.u32 4294901760, %v571_v35 }
 0x148   : > { %615 = vmatpush1.msra.mxu0 %v2254_v4  ;;  %v714_v39 = vand.u32 4294901760, %v713_v62  ;;  %v721_v40 = vand.u32 4294901760, %v720_v12  ;;  %v728_v41 = vand.u32 4294901760, %v727_v28  ;;  %v2843_v43 = vand.u32 4294901760, %v2304_v63 }
 0x149   : > { %616 = vmatprep.subr.mxu0 %v1752_v51  ;;  %v2326_v44 = vsub.f32 %v573_v8, %v2287_v61  ;;  %v2330_v36 = vand.u32 4294901760, %v570_v15  ;;  %v735_v1 = vand.u32 4294901760, %v734_v14  ;;  %v748_v37 = vsub.f32 %v2291_v29, %v2845_v30  ;;  %v590_v8 = vld [vmem:[#allocation3 + $0xc0] sm:$0xff]  ;;  %v589_v14 = vld [vmem:[#allocation3 + $0xb8] sm:$0xff] }
 0x14a   : > { %618 = vmatpush1.msra.mxu0 %v2256_v20  ;;  %715 = vmatpush1.msra.mxu1 %v714_v39  ;;  %v2841_v17 = vand.u32 4294901760, %v2319_v33  ;;  %v2338_v18 = vsub.f32 %v572_v48, %v2307_v32  ;;  %v742_v0 = vand.u32 4294901760, %v741_v31  ;;  %v755_v16 = vsub.f32 %v2304_v63, %v2843_v43  ;;  %v585_v43 = vld [vmem:[#allocation3 + $0x98] sm:$0xff] }
 0x14b   : > { %619 = vmatprep.subr.mxu0 %v1752_v51  ;;  %716 = vmatprep.subr.mxu1 %v1752_v51  ;;  %v2346_v46 = vand.u32 4294901760, %v569_v3  ;;  %v2839_v19 = vand.u32 4294901760, %v2326_v44  ;;  %v2350_v45 = vsub.f32 %v571_v35, %v2322_v42  ;;  %v2354_v47 = vand.u32 4294901760, %v568_v2 }
 0x14c   : > { %621 = vmatpush1.msra.mxu0 %v2258_v21  ;;  %722 = vmatpush1.msra.mxu1 %v721_v40  ;;  %v2357_v57 = vsub.f32 %v570_v15, %v2330_v36  ;;  %v749_v24 = vand.u32 4294901760, %v748_v37  ;;  %v762_v49 = vsub.f32 %v2319_v33, %v2841_v17  ;;  %v2838_v50 = vand.u32 4294901760, %v2338_v18 }
 0x14d   : > { %622 = vmatprep.subr.mxu0 %v1752_v51  ;;  %723 = vmatprep.subr.mxu1 %v1752_v51  ;;  %v2366_v5 = vand.u32 4294901760, %v567_v52  ;;  %v756_v6 = vand.u32 4294901760, %v755_v16  ;;  %v769_v22 = vsub.f32 %v2326_v44, %v2839_v19  ;;  %v2836_v9 = vand.u32 4294901760, %v2350_v45 }
 0x14e   : > { %624 = vmatpush1.msra.mxu0 %v2267_v54  ;;  %729 = vmatpush1.msra.mxu1 %v728_v41  ;;  %v2374_v48 = vsub.f32 %v569_v3, %v2346_v46  ;;  %v2837_v62 = vand.u32 4294901760, %v2357_v57  ;;  %v2380_v12 = vsub.f32 %v568_v2, %v2354_v47  ;;  %v763_v28 = vand.u32 4294901760, %v762_v49  ;;  %v591_v2 = vld [vmem:[#allocation2] sm:$0x3] }
 0x14f   : > { %625 = vmatprep.subr.mxu0 %v1752_v51  ;;  %730 = vmatprep.subr.mxu1 %v1752_v51  ;;  %v776_v35 = vsub.f32 %v2338_v18, %v2838_v50  ;;  %v2386_v39 = vand.u32 4294901760, %v566_v38  ;;  %v2390_v40 = vand.u32 4294901760, %v590_v8  ;;  %v599_v15 = vsub.s32 1, %v2091_v56  ;;  %v586_v50 = vld [vmem:[#allocation3 + $0xa0] sm:$0xff] }
 0x150   : > { %627 = vmatpush1.msra.mxu0 %v2283_v27  ;;  %736 = vmatpush1.msra.mxu1 %v735_v1  ;;  %v770_v31 = vand.u32 4294901760, %v769_v22  ;;  %v783_v41 = vsub.f32 %v2350_v45, %v2836_v9  ;;  %v2840_v3 = vand.u32 4294901760, %v2374_v48  ;;  %v588_v1 = vld [vmem:[#allocation3 + $0xb0] sm:$0xff]  ;;  %v2399_v37 = vsub.f32 %v567_v52, %v2366_v5 }
 0x151   : > { %628 = vmatprep.subr.mxu0 %v1752_v51  ;;  %737 = vmatprep.subr.mxu1 %v1752_v51  ;;  %v2842_v16 = vand.u32 4294901760, %v2380_v12  ;;  %v2408_v49 = vand.u32 4294901760, %v589_v14  ;;  %v2411_v52 = vsub.f32 %v566_v38, %v2386_v39  ;;  %v595_v22 = vsub.s32 0, %v2091_v56 }
 0x152   : > { %630 = vmatpush1.msra.mxu0 %v2287_v61  ;;  %743 = vmatpush1.msra.mxu1 %v742_v0  ;;  %v790_v0 = vsub.f32 %v2357_v57, %v2837_v62  ;;  %v2416_v9 = vand.u32 4294901760, %v588_v1  ;;  %v600_v62 = vrot.slane %v591_v2, %v599_v15  ;;  %v2844_v38 = vand.u32 4294901760, %v2399_v37 }
 0x153   : > { %631 = vmatprep.subr.mxu0 %v1752_v51  ;;  %744 = vmatprep.subr.mxu1 %v1752_v51  ;;  %2864 = vst [vmem:[#allocation10_spill] sm:$0xff] %v2408_v49  ;;  %v2424_v56 = vsub.f32 %v590_v8, %v2390_v40  ;;  %v804_v15 = vsub.f32 %v2380_v12, %v2842_v16 }
 0x154   : > { %633 = vmatpush1.msra.mxu0 %v2307_v32  ;;  %750 = vmatpush1.msra.mxu1 %v749_v24  ;;  %v777_v24 = vand.u32 4294901760, %v776_v35  ;;  %2865 = vst [vmem:[#allocation11_spill] sm:$0xff] %v2416_v9  ;;  %v797_v35 = vsub.f32 %v2374_v48, %v2840_v3  ;;  %v791_v19 = vand.u32 4294901760, %v790_v0  ;;  %v2436_v3 = vsub.f32 %v589_v14, %v2408_v49 }
 0x155   : > { %634 = vmatprep.subr.mxu0 %v1752_v51  ;;  %751 = vmatprep.subr.mxu1 %v1752_v51  ;;  %v596_v8 = vrot.slane %v591_v2, %v595_v22  ;;  %v602_v17 = vsel %vm332_vm1, %v600_v62, 0  ;;  %v2441_v0 = vand.u32 4294901760, %v586_v50  ;;  %v2851_v14 = vand.u32 4294901760, %v2424_v56 }
 0x156   : > { %636 = vmatpush1.msra.mxu0 %v2322_v42  ;;  %757 = vmatpush1.msra.mxu1 %v756_v6  ;;  %v587_v6 = vld [vmem:[#allocation3 + $0xa8] sm:$0xff]  ;;  %v798_v16 = vand.u32 4294901760, %v797_v35  ;;  %v2449_v2 = vsub.f32 %v588_v1, %v2416_v9  ;;  %v805_v62 = vand.u32 4294901760, %v804_v15  ;;  %v2453_v22 = vand.u32 4294901760, %v602_v17 }
 0x157   : > { %637 = vmatprep.subr.mxu0 %v1752_v51  ;;  %758 = vmatprep.subr.mxu1 %v1752_v51  ;;  %2866 = vst [vmem:[#allocation12_spill] sm:$0xff] %v2441_v0  ;;  %v2853_v35 = vand.u32 4294901760, %v2436_v3  ;;  %v2463_v30 = vand.u32 4294901760, %v596_v8  ;;  %v2467_v15 = vand.u32 4294901760, %v585_v43  ;;  %v2475_v60 = vsub.f32 %v586_v50, %v2441_v0 }
 0x158   : > { %639 = vmatpush1.msra.mxu0 %v2330_v36  ;;  %764 = vmatpush1.msra.mxu1 %v763_v28  ;;  %v784_v28 = vand.u32 4294901760, %v783_v41  ;;  %v2846_v41 = vand.u32 4294901760, %v2411_v52  ;;  %v2482_v10 = vsub.f32 %v602_v17, %v2453_v22 }
 0x159   : > { %640 = vmatprep.subr.mxu0 %v1752_v51  ;;  %765 = vmatprep.subr.mxu1 %v1752_v51  ;;  %2867 = vst [vmem:[#allocation13_spill] sm:$0xff] %v2467_v15  ;;  %v2490_v11 = vsub.f32 %v596_v8, %v2463_v30  ;;  %v2497_v13 = vsub.f32 %v585_v43, %v2467_v15 }
 0x15a   : > { %642 = vmatpush1.msra.mxu0 %v2346_v46  ;;  %771 = vmatpush1.msra.mxu1 %v770_v31  ;;  %v2431_v31 = vand.u32 4294901760, %v587_v6 }
 0x15b   : > { %643 = vmatprep.subr.mxu0 %v1752_v51  ;;  %772 = vmatprep.subr.mxu1 %v1752_v51 }
 0x15c   : > { %645 = vmatpush1.msra.mxu0 %v2354_v47  ;;  %778 = vmatpush1.msra.mxu1 %v777_v24  ;;  %v811_v24 = vsub.f32 %v2399_v37, %v2844_v38  ;;  %v584_v38 = vld [vmem:[#allocation3 + $0x90] sm:$0xff]  ;;  %v2461_v1 = vsub.f32 %v587_v6, %v2431_v31  ;;  %v583_v6 = vld [vmem:[#allocation3 + $0x88] sm:$0xff] }
 0x15d   : > { %646 = vmatprep.subr.mxu0 %v1752_v51  ;;  %779 = vmatprep.subr.mxu1 %v1752_v51  ;;  %v2479_v26 = vand.u32 4294901760, %v584_v38  ;;  %v2494_v17 = vand.u32 4294901760, %v583_v6 }
 0x15e   : > { %648 = vmatpush1.msra.mxu0 %v2366_v5  ;;  %785 = vmatpush1.msra.mxu1 %v784_v28  ;;  %v818_v28 = vsub.f32 %v2411_v52, %v2846_v41  ;;  %v839_v41 = vsub.f32 %v2424_v56, %v2851_v14  ;;  %v582_v14 = vld [vmem:[#allocation3 + $0x80] sm:$0xff] }
 0x15f   : > { %649 = vmatprep.subr.mxu0 %v1752_v51  ;;  %786 = vmatprep.subr.mxu1 %v1752_v51  ;;  %v2506_v50 = vand.u32 4294901760, %v582_v14  ;;  %v2510_v43 = vsub.f32 %v584_v38, %v2479_v26 }
 0x160   : > { %651 = vmatpush1.msra.mxu0 %v2386_v39  ;;  %792 = vmatpush1.msra.mxu1 %v791_v19  ;;  %v812_v19 = vand.u32 4294901760, %v811_v24  ;;  %v846_v24 = vsub.f32 %v2436_v3, %v2853_v35 }
 0x161   : > { %666 = vmatprep.subr.mxu0 %v1752_v51  ;;  %793 = vmatprep.subr.mxu1 %v1752_v51 }
 0x162   : > { %668 = vmatpush2.msra.mxu0 %v2390_v40  ;;  %799 = vmatpush1.msra.mxu1 %v798_v16  ;;  %v819_v16 = vand.u32 4294901760, %v818_v28  ;;  %v2868_v28 = vand.u32 4294901760, %v2449_v2 }
 0x163   : > { %669 = vmatprep.subr.mxu0 %v1752_v51  ;;  %800 = vmatprep.subr.mxu1 %v1752_v51 }
 0x164   : > { %671 = vmatpush2.msra.mxu0 %v2408_v49  ;;  %806 = vmatpush1.msra.mxu1 %v805_v62  ;;  %v840_v62 = vand.u32 4294901760, %v839_v41  ;;  %v853_v35 = vsub.f32 %v2449_v2, %v2868_v28  ;;  %v847_v41 = vand.u32 4294901760, %v846_v24  ;;  %v2521_v49 = vsub.f32 %v583_v6, %v2494_v17 }
 0x165   : > { %672 = vmatprep.subr.mxu0 %v1752_v51  ;;  %807 = vmatprep.subr.mxu1 %v1752_v51  ;;  %v2534_v6 = vsub.f32 %v582_v14, %v2506_v50 }
 0x166   : > { %674 = vmatpush2.msra.mxu0 %v2416_v9  ;;  %813 = vmatpush1.msra.mxu1 %v812_v19  ;;  %v2869_v19 = vand.u32 4294901760, %v2461_v1  ;;  %v854_v38 = vand.u32 4294901760, %v853_v35  ;;  %v887_v9 = vand.u32 4294901760, %v2521_v49 }
 0x167   : > { %675 = vmatprep.subr.mxu0 %v1752_v51  ;;  %814 = vmatprep.subr.mxu1 %v1752_v51 }
 0x168   : > { %677 = vmatpush2.msra.mxu0 %v2431_v31  ;;  %820 = vmatpush1.msra.mxu1 %v819_v16  ;;  %v860_v28 = vsub.f32 %v2461_v1, %v2869_v19  ;;  %v2870_v16 = vand.u32 4294901760, %v2475_v60  ;;  %v2871_v19 = vand.u32 4294901760, %v2482_v10 }
 0x169   : > { %678 = vmatprep.subr.mxu0 %v1752_v51  ;;  %835 = vmatprep.subr.mxu1 %v1752_v51 }
 0x16a   : > { %680 = vmatpush2.msra.mxu0 %v2441_v0  ;;  %841 = vmatpush2.msra.mxu1 %v840_v62  ;;  %v867_v24 = vsub.f32 %v2475_v60, %v2870_v16  ;;  %v696_v8 = vsub.f32 %v2482_v10, %v2871_v19  ;;  %v861_v35 = vand.u32 4294901760, %v860_v28  ;;  %v2872_v62 = vand.u32 4294901760, %v2490_v11 }
 0x16b   : > { %681 = vmatprep.subr.mxu0 %v1752_v51  ;;  %842 = vmatprep.subr.mxu1 %v1752_v51  ;;  %v2873_v0 = vand.u32 4294901760, %v2497_v13  ;;  %v2874_v28 = vand.u32 4294901760, %v2510_v43 }
 0x16c   : > { %683 = vmatpush2.msra.mxu0 %v2467_v15  ;;  %848 = vmatpush2.msra.mxu1 %v847_v41  ;;  %v702_v16 = vsub.f32 %v2490_v11, %v2872_v62  ;;  %v868_v14 = vand.u32 4294901760, %v867_v24  ;;  %v697_v41 = vand.u32 4294901760, %v696_v8  ;;  %v894_v15 = vand.u32 4294901760, %v2534_v6 }
 0x16d   : > { %684 = vmatprep.subr.mxu0 %v1752_v51  ;;  %849 = vmatprep.subr.mxu1 %v1752_v51  ;;  %v874_v19 = vsub.f32 %v2497_v13, %v2873_v0  ;;  %v881_v62 = vsub.f32 %v2510_v43, %v2874_v28  ;;  %v888_v24 = vsub.f32 %v2521_v49, %v887_v9  ;;  %v2877_v28 = vld [vmem:[#allocation12_spill] sm:$0xff] }
 0x16e   : > { %686 = vmatpush2.msra.mxu0 %v2479_v26  ;;  %855 = vmatpush2.msra.mxu1 %v854_v38  ;;  %v703_v0 = vand.u32 4294901760, %v702_v16 }
 0x16f   : > { %687 = vmatprep.subr.mxu0 %v1752_v51  ;;  %856 = vmatprep.subr.mxu1 %v1752_v51  ;;  %v875_v38 = vand.u32 4294901760, %v874_v19  ;;  %v882_v8 = vand.u32 4294901760, %v881_v62  ;;  %v889_v16 = vand.u32 4294901760, %v888_v24  ;;  %v2878_v62 = vld [vmem:[#allocation13_spill] sm:$0xff]  ;;  %v2881_v24 = vand.u32 4294901760, %v2270_v55 }
 0x170   : > { %689 = vmatpush2.msra.mxu0 %v2494_v17  ;;  %862 = vmatpush2.msra.mxu1 %v861_v35  ;;  %v895_v35 = vsub.f32 %v2534_v6, %v894_v15 }
 0x171   : > { %690 = vmatprep.subr.mxu0 %v1752_v51  ;;  %863 = vmatprep.subr.mxu1 %v1752_v51 }
 0x172   : > { %692 = vmatpush2.msra.mxu0 %v2506_v50  ;;  %869 = vmatpush2.msra.mxu1 %v868_v14  ;;  %v896_v19 = vand.u32 4294901760, %v895_v35  ;;  %v2875_v14 = vld [vmem:[#allocation10_spill] sm:$0xff] }
 0x173   : > { %698 = vmatprep.mubr.f32.mxu0 %v697_v41  ;;  %870 = vmatprep.subr.mxu1 %v1752_v51  ;;  %v2876_v41 = vld [vmem:[#allocation11_spill] sm:$0xff] }
 0x174   : > { %906 = vmatprep.subr.mxu0 %v1752_v51  ;;  %704 = vmatmul.mubr.f32.vlgmr.msra.gmra.mxu0 %v703_v0  ;;  %v2879_v0 = vand.u32 4294901760, %v2262_v25 }
 0x175   : > { %876 = vmatpush2.msra.mxu1 %v875_v38  ;;  %909 = vmatpush1.msra.mxu0 %v2262_v25  ;;  %v2880_v38 = vand.u32 4294901760, %v2265_v53  ;;  %v2882_v25 = vand.u32 4294901760, %v2482_v10 }
 0x176   : > { %877 = vmatprep.subr.mxu1 %v1752_v51  ;;  %910 = vmatprep.subr.mxu0 %v1752_v51 }
 0x177   : > { %883 = vmatpush2.msra.mxu1 %v882_v8  ;;  %913 = vmatpush1.msra.mxu0 %v2265_v53  ;;  %v2883_v53 = vand.u32 4294901760, %v2274_v58  ;;  %v2884_v8 = vand.u32 4294901760, %v2490_v11 }
 0x178   : > { %884 = vmatprep.subr.mxu1 %v1752_v51  ;;  %914 = vmatprep.subr.mxu0 %v1752_v51 }
 0x179   : > { %890 = vmatpush2.msra.mxu1 %v889_v16  ;;  %917 = vmatpush1.msra.mxu0 %v2270_v55  ;;  %v2885_v55 = vand.u32 4294901760, %v2277_v59 }
 0x17a   : > { %891 = vmatprep.subr.mxu1 %v1752_v51  ;;  %918 = vmatprep.subr.mxu0 %v1752_v51 }
 0x17b   : > { %897 = vmatpush2.msra.mxu1 %v896_v19  ;;  %899 = vmatprep.mubr.f32.mxu1 %v2453_v22 }
 0x17c   : > { %921 = vmatpush1.msra.mxu0 %v2274_v58  ;;  %901 = vmatmul.mubr.f32.vlgmr.msra.gmra.mxu1 %v2463_v30  ;;  %v2887_v58 = vand.u32 4294901760, %v2304_v63 }
 0x17d   : > { %922 = vmatprep.subr.mxu0 %v1752_v51  ;;  %1030 = vmatprep.subr.mxu1 %v1752_v51 }
 0x17e   : > { %925 = vmatpush1.msra.mxu0 %v2277_v59  ;;  %1032 = vmatpush1.msra.mxu1 %v2247_v7  ;;  %v2895_v59 = vand.u32 4294901760, %v2399_v37 }
 0x17f   : > { %926 = vmatprep.subr.mxu0 %v1752_v51  ;;  %1033 = vmatprep.subr.mxu1 %v1752_v51 }
 0x180   : > { %929 = vmatpush1.msra.mxu0 %v2291_v29  ;;  %1035 = vmatpush1.msra.mxu1 %v2249_v34 }
 0x181   : > { %930 = vmatprep.subr.mxu0 %v1752_v51  ;;  %1036 = vmatprep.subr.mxu1 %v1752_v51 }
 0x182   : > { %933 = vmatpush1.msra.mxu0 %v2304_v63  ;;  %1038 = vmatpush1.msra.mxu1 %v2251_v23  ;;  %v2900_v63 = vand.u32 4294901760, %v2461_v1 }
 0x183   : > { %934 = vmatprep.subr.mxu0 %v1752_v51  ;;  %1039 = vmatprep.subr.mxu1 %v1752_v51 }
 0x184   : > { %937 = vmatpush1.msra.mxu0 %v2319_v33  ;;  %1041 = vmatpush1.msra.mxu1 %v2254_v4 }
 0x185   : > { %938 = vmatprep.subr.mxu0 %v1752_v51  ;;  %1042 = vmatprep.subr.mxu1 %v1752_v51 }
 0x186   : > { %941 = vmatpush1.msra.mxu0 %v2326_v44  ;;  %1044 = vmatpush1.msra.mxu1 %v2256_v20 }
 0x187   : > { %942 = vmatprep.subr.mxu0 %v1752_v51  ;;  %1045 = vmatprep.subr.mxu1 %v1752_v51 }
 0x188   : > { %945 = vmatpush1.msra.mxu0 %v2338_v18  ;;  %1047 = vmatpush1.msra.mxu1 %v2258_v21 }
 0x189   : > { %946 = vmatprep.subr.mxu0 %v1752_v51  ;;  %1048 = vmatprep.subr.mxu1 %v1752_v51 }
 0x18a   : > { %949 = vmatpush1.msra.mxu0 %v2350_v45  ;;  %1050 = vmatpush1.msra.mxu1 %v2267_v54 }
 0x18b   : > { %950 = vmatprep.subr.mxu0 %v1752_v51  ;;  %1051 = vmatprep.subr.mxu1 %v1752_v51 }
 0x18c   : > { %953 = vmatpush1.msra.mxu0 %v2357_v57  ;;  %1053 = vmatpush1.msra.mxu1 %v2283_v27 }
 0x18d   : > { %954 = vmatprep.subr.mxu0 %v1752_v51  ;;  %1054 = vmatprep.subr.mxu1 %v1752_v51 }
 0x18e   : > { %957 = vmatpush1.msra.mxu0 %v2374_v48  ;;  %1056 = vmatpush1.msra.mxu1 %v2287_v61 }
 0x18f   : > { %958 = vmatprep.subr.mxu0 %v1752_v51  ;;  %1057 = vmatprep.subr.mxu1 %v1752_v51 }
 0x190   : > { %961 = vmatpush1.msra.mxu0 %v2380_v12  ;;  %1059 = vmatpush1.msra.mxu1 %v2307_v32 }
 0x191   : > { %962 = vmatprep.subr.mxu0 %v1752_v51  ;;  %1060 = vmatprep.subr.mxu1 %v1752_v51 }
 0x192   : > { %965 = vmatpush1.msra.mxu0 %v2399_v37  ;;  %1062 = vmatpush1.msra.mxu1 %v2322_v42 }
 0x193   : > { %966 = vmatprep.subr.mxu0 %v1752_v51  ;;  %1063 = vmatprep.subr.mxu1 %v1752_v51 }
 0x194   : > { %969 = vmatpush1.msra.mxu0 %v2411_v52  ;;  %1065 = vmatpush1.msra.mxu1 %v2330_v36 }
 0x195   : > { %984 = vmatprep.subr.mxu0 %v1752_v51  ;;  %1066 = vmatprep.subr.mxu1 %v1752_v51 }
 0x196   : > { %987 = vmatpush2.msra.mxu0 %v2424_v56  ;;  %1068 = vmatpush1.msra.mxu1 %v2346_v46 }
 0x197   : > { %988 = vmatprep.subr.mxu0 %v1752_v51  ;;  %1069 = vmatprep.subr.mxu1 %v1752_v51 }
 0x198   : > { %991 = vmatpush2.msra.mxu0 %v2436_v3  ;;  %1071 = vmatpush1.msra.mxu1 %v2354_v47 }
 0x199   : > { %992 = vmatprep.subr.mxu0 %v1752_v51  ;;  %1072 = vmatprep.subr.mxu1 %v1752_v51 }
 0x19a   : > { %995 = vmatpush2.msra.mxu0 %v2449_v2  ;;  %1074 = vmatpush1.msra.mxu1 %v2366_v5 }
 0x19b   : > { %996 = vmatprep.subr.mxu0 %v1752_v51  ;;  %1075 = vmatprep.subr.mxu1 %v1752_v51 }
 0x19c   : > { %999 = vmatpush2.msra.mxu0 %v2461_v1  ;;  %1077 = vmatpush1.msra.mxu1 %v2386_v39 }
 0x19d   : > { %1000 = vmatprep.subr.mxu0 %v1752_v51  ;;  %1092 = vmatprep.subr.mxu1 %v1752_v51 }
 0x19e   : > { %1003 = vmatpush2.msra.mxu0 %v2475_v60  ;;  %1094 = vmatpush2.msra.mxu1 %v2390_v40 }
 0x19f   : > { %1004 = vmatprep.subr.mxu0 %v1752_v51  ;;  %1095 = vmatprep.subr.mxu1 %v1752_v51 }
 0x1a0   : > { %1007 = vmatpush2.msra.mxu0 %v2497_v13  ;;  %1097 = vmatpush2.msra.mxu1 %v2875_v14 }
 0x1a1   : > { %1008 = vmatprep.subr.mxu0 %v1752_v51  ;;  %1098 = vmatprep.subr.mxu1 %v1752_v51 }
 0x1a2   : > { %1011 = vmatpush2.msra.mxu0 %v2510_v43  ;;  %1100 = vmatpush2.msra.mxu1 %v2876_v41 }
 0x1a3   : > { %1012 = vmatprep.subr.mxu0 %v1752_v51  ;;  %1101 = vmatprep.subr.mxu1 %v1752_v51 }
 0x1a4   : > { %1015 = vmatpush2.msra.mxu0 %v2521_v49  ;;  %1103 = vmatpush2.msra.mxu1 %v2431_v31 }
 0x1a5   : > { %1016 = vmatprep.subr.mxu0 %v1752_v51  ;;  %1104 = vmatprep.subr.mxu1 %v1752_v51 }
 0x1a6   : > { %1019 = vmatpush2.msra.mxu0 %v2534_v6  ;;  %1022 = vmatprep.mubr.f32.mxu0 %v2482_v10  ;;  %v2886_v10 = vand.u32 4294901760, %v2291_v29  ;;  %v2899_v29 = vand.u32 4294901760, %v2449_v2 }
 0x1a7   : > { %1106 = vmatpush2.msra.mxu1 %v2877_v28  ;;  %1025 = vmatmul.mubr.f32.vlgmr.msra.gmra.mxu0 %v2490_v11  ;;  %v2896_v11 = vand.u32 4294901760, %v2411_v52 }
 0x1a8   : > { %1107 = vmatprep.subr.mxu1 %v1752_v51  ;;  %1131 = vmatprep.subr.mxu0 %v1752_v51 }
 0x1a9   : > { %1109 = vmatpush2.msra.mxu1 %v2878_v62  ;;  %1135 = vmatpush1.msra.mxu0 %v2879_v0 }
 0x1aa   : > { %1110 = vmatprep.subr.mxu1 %v1752_v51  ;;  %1136 = vmatprep.subr.mxu0 %v1752_v51 }
 0x1ab   : > { %1112 = vmatpush2.msra.mxu1 %v2479_v26  ;;  %1140 = vmatpush1.msra.mxu0 %v2880_v38 }
 0x1ac   : > { %1113 = vmatprep.subr.mxu1 %v1752_v51  ;;  %1141 = vmatprep.subr.mxu0 %v1752_v51 }
 0x1ad   : > { %1115 = vmatpush2.msra.mxu1 %v2494_v17  ;;  %1145 = vmatpush1.msra.mxu0 %v2881_v24 }
 0x1ae   : > { %1116 = vmatprep.subr.mxu1 %v1752_v51  ;;  %1146 = vmatprep.subr.mxu0 %v1752_v51 }
 0x1af   : > { %1118 = vmatpush2.msra.mxu1 %v2506_v50  ;;  %1122 = vmatprep.mubr.f32.mxu1 %v2882_v25 }
 0x1b0   : > { %1150 = vmatpush1.msra.mxu0 %v2883_v53  ;;  %1126 = vmatmul.mubr.f32.vlgmr.msra.gmra.mxu1 %v2884_v8 }
 0x1b1   : > { %1151 = vmatprep.subr.mxu0 %v1752_v51  ;;  %1278 = vmatprep.subr.mxu1 %v1752_v51 }
 0x1b2   : > { %1155 = vmatpush1.msra.mxu0 %v2885_v55  ;;  %1280 = vmatpush1.msra.mxu1 %v2247_v7  ;;  %v2888_v7 = vand.u32 4294901760, %v2319_v33  ;;  %v2902_v33 = vand.u32 4294901760, %v2497_v13 }
 0x1b3   : > { %1156 = vmatprep.subr.mxu0 %v1752_v51  ;;  %1281 = vmatprep.subr.mxu1 %v1752_v51 }
 0x1b4   : > { %1160 = vmatpush1.msra.mxu0 %v2886_v10  ;;  %1283 = vmatpush1.msra.mxu1 %v2249_v34  ;;  %v2889_v34 = vand.u32 4294901760, %v2326_v44 }
 0x1b5   : > { %1161 = vmatprep.subr.mxu0 %v1752_v51  ;;  %1284 = vmatprep.subr.mxu1 %v1752_v51 }
 0x1b6   : > { %1165 = vmatpush1.msra.mxu0 %v2887_v58  ;;  %1286 = vmatpush1.msra.mxu1 %v2251_v23  ;;  %v2890_v23 = vand.u32 4294901760, %v2338_v18 }
 0x1b7   : > { %1166 = vmatprep.subr.mxu0 %v1752_v51  ;;  %1287 = vmatprep.subr.mxu1 %v1752_v51 }
 0x1b8   : > { %1170 = vmatpush1.msra.mxu0 %v2888_v7  ;;  %1289 = vmatpush1.msra.mxu1 %v2254_v4  ;;  %v2891_v4 = vand.u32 4294901760, %v2350_v45 }
 0x1b9   : > { %1171 = vmatprep.subr.mxu0 %v1752_v51  ;;  %1290 = vmatprep.subr.mxu1 %v1752_v51 }
 0x1ba   : > { %1175 = vmatpush1.msra.mxu0 %v2889_v34  ;;  %1292 = vmatpush1.msra.mxu1 %v2256_v20  ;;  %v2892_v20 = vand.u32 4294901760, %v2357_v57 }
 0x1bb   : > { %1176 = vmatprep.subr.mxu0 %v1752_v51  ;;  %1293 = vmatprep.subr.mxu1 %v1752_v51 }
 0x1bc   : > { %1180 = vmatpush1.msra.mxu0 %v2890_v23  ;;  %1295 = vmatpush1.msra.mxu1 %v2258_v21  ;;  %v2893_v21 = vand.u32 4294901760, %v2374_v48 }
 0x1bd   : > { %1181 = vmatprep.subr.mxu0 %v1752_v51  ;;  %1296 = vmatprep.subr.mxu1 %v1752_v51 }
 0x1be   : > { %1185 = vmatpush1.msra.mxu0 %v2891_v4  ;;  %1298 = vmatpush1.msra.mxu1 %v2267_v54  ;;  %v2894_v54 = vand.u32 4294901760, %v2380_v12 }
 0x1bf   : > { %1186 = vmatprep.subr.mxu0 %v1752_v51  ;;  %1299 = vmatprep.subr.mxu1 %v1752_v51 }
 0x1c0   : > { %1190 = vmatpush1.msra.mxu0 %v2892_v20  ;;  %1301 = vmatpush1.msra.mxu1 %v2283_v27  ;;  %v2897_v27 = vand.u32 4294901760, %v2424_v56 }
 0x1c1   : > { %1191 = vmatprep.subr.mxu0 %v1752_v51  ;;  %1302 = vmatprep.subr.mxu1 %v1752_v51 }
 0x1c2   : > { %1195 = vmatpush1.msra.mxu0 %v2893_v21  ;;  %1304 = vmatpush1.msra.mxu1 %v2287_v61  ;;  %v2898_v61 = vand.u32 4294901760, %v2436_v3 }
 0x1c3   : > { %1196 = vmatprep.subr.mxu0 %v1752_v51  ;;  %1305 = vmatprep.subr.mxu1 %v1752_v51 }
 0x1c4   : > { %1200 = vmatpush1.msra.mxu0 %v2894_v54  ;;  %1307 = vmatpush1.msra.mxu1 %v2307_v32  ;;  %v2901_v32 = vand.u32 4294901760, %v2475_v60 }
 0x1c5   : > { %1201 = vmatprep.subr.mxu0 %v1752_v51  ;;  %1308 = vmatprep.subr.mxu1 %v1752_v51 }
 0x1c6   : > { %1205 = vmatpush1.msra.mxu0 %v2895_v59  ;;  %1310 = vmatpush1.msra.mxu1 %v2322_v42  ;;  %v2903_v42 = vand.u32 4294901760, %v2510_v43 }
 0x1c7   : > { %1206 = vmatprep.subr.mxu0 %v1752_v51  ;;  %1311 = vmatprep.subr.mxu1 %v1752_v51 }
 0x1c8   : > { %1210 = vmatpush1.msra.mxu0 %v2896_v11  ;;  %1313 = vmatpush1.msra.mxu1 %v2330_v36 }
 0x1c9   : > { %1225 = vmatprep.subr.mxu0 %v1752_v51  ;;  %1314 = vmatprep.subr.mxu1 %v1752_v51 }
 0x1ca   : > { %1229 = vmatpush2.msra.mxu0 %v2897_v27  ;;  %1316 = vmatpush1.msra.mxu1 %v2346_v46 }
 0x1cb   : > { %1230 = vmatprep.subr.mxu0 %v1752_v51  ;;  %1317 = vmatprep.subr.mxu1 %v1752_v51 }
 0x1cc   : > { %1234 = vmatpush2.msra.mxu0 %v2898_v61  ;;  %1319 = vmatpush1.msra.mxu1 %v2354_v47 }
 0x1cd   : > { %1235 = vmatprep.subr.mxu0 %v1752_v51  ;;  %1320 = vmatprep.subr.mxu1 %v1752_v51 }
 0x1ce   : > { %1239 = vmatpush2.msra.mxu0 %v2899_v29  ;;  %1322 = vmatpush1.msra.mxu1 %v2366_v5 }
 0x1cf   : > { %1240 = vmatprep.subr.mxu0 %v1752_v51  ;;  %1323 = vmatprep.subr.mxu1 %v1752_v51 }
 0x1d0   : > { %1244 = vmatpush2.msra.mxu0 %v2900_v63  ;;  %1325 = vmatpush1.msra.mxu1 %v2386_v39 }
 0x1d1   : > { %1245 = vmatprep.subr.mxu0 %v1752_v51  ;;  %1340 = vmatprep.subr.mxu1 %v1752_v51 }
 0x1d2   : > { %1249 = vmatpush2.msra.mxu0 %v2901_v32  ;;  %1342 = vmatpush2.msra.mxu1 %v2390_v40 }
 0x1d3   : > { %1250 = vmatprep.subr.mxu0 %v1752_v51  ;;  %1343 = vmatprep.subr.mxu1 %v1752_v51 }
 0x1d4   : > { %1254 = vmatpush2.msra.mxu0 %v2902_v33  ;;  %1345 = vmatpush2.msra.mxu1 %v2875_v14 }
 0x1d5   : > { %1255 = vmatprep.subr.mxu0 %v1752_v51  ;;  %1346 = vmatprep.subr.mxu1 %v1752_v51 }
 0x1d6   : > { %1259 = vmatpush2.msra.mxu0 %v2903_v42  ;;  %1348 = vmatpush2.msra.mxu1 %v2876_v41 }
 0x1d7   : > { %1260 = vmatprep.subr.mxu0 %v1752_v51  ;;  %1349 = vmatprep.subr.mxu1 %v1752_v51 }
 0x1d8   : > { %1264 = vmatpush2.msra.mxu0 %v887_v9  ;;  %1351 = vmatpush2.msra.mxu1 %v2431_v31 }
 0x1d9   : > { %1265 = vmatprep.subr.mxu0 %v1752_v51  ;;  %1352 = vmatprep.subr.mxu1 %v1752_v51 }
 0x1da   : > { %1269 = vmatpush2.msra.mxu0 %v894_v15  ;;  %1271 = vmatprep.mubr.f32.mxu0 %v2453_v22 }
 0x1db   : > { %1354 = vmatpush2.msra.mxu1 %v2877_v28  ;;  %1273 = vmatmul.mubr.f32.vlgmr.msra.gmra.mxu0 %v2463_v30 }
 0x1dc   : > { %1355 = vmatprep.subr.mxu1 %v1752_v51  ;;  %1368 = vmatprep.mubr.f32.mxu1 %v2453_v22 }
 0x1dd   : > { %1357 = vmatpush2.msra.mxu1 %v2878_v62 }
 0x1de   : > { %1358 = vmatprep.subr.mxu1 %v1752_v51 }
 0x1df   : > { %1360 = vmatpush2.msra.mxu1 %v2479_v26 }
 0x1e0   : > { %1361 = vmatprep.subr.mxu1 %v1752_v51 }
 0x1e1   : > { %1363 = vmatpush2.msra.mxu1 %v2494_v17 }
 0x1e2   : > { %1364 = vmatprep.subr.mxu1 %v1752_v51 }
 0x1e3   : > { %1366 = vmatpush2.msra.mxu1 %v2506_v50 }
 0x1e4   : > { %1370 = vmatmul.mubr.f32.vlgmr.msra.gmra.mxu1 %v2463_v30 }
 0x234   : > { %v705_v60 = vpop.f32.mrf.mxu0 }
 0x236   : > { %v707_v13 = vpop.f32.mrf.mxu0 }
 0x23c   : > { %v902_v44 = vpop.f32.mrf.mxu1 }
 0x23d   : > { %v903_v36 = vadd.f32 %v902_v44, %v705_v60 }
 0x23e   : > { %v904_v18 = vpop.f32.mrf.mxu1 }
 0x267   : > { %v1026_v46 = vpop.f32.mrf.mxu0 }
 0x268   : > { %v1027_v9 = vadd.f32 %v1026_v46, %v903_v36 }
 0x269   : > { %v1028_v45 = vpop.f32.mrf.mxu0 }
 0x270   : > { %v1127_v47 = vpop.f32.mrf.mxu1 }
 0x271   : > { %v1128_v48 = vadd.f32 %v1127_v47, %v1027_v9 }
 0x272   : > { %v1129_v26 = vpop.f32.mrf.mxu1 }
 0x29b   : > { %v1274_v57 = vpop.f32.mrf.mxu0 }
 0x29c   : > { %v1275_v12 = vadd.f32 %v1274_v57, %v1128_v48 }
 0x29d   : > { %v1276_v5 = vpop.f32.mrf.mxu0 }
 0x2a4   : > { %v1371_v51 = vpop.f32.mrf.mxu1 }
 0x2a5   : > { %v1372_v39 = vadd.f32 %v1371_v51, %v1275_v12 }
 0x2a6   : > { %v1373_v40 = vpop.f32.mrf.mxu1 }
 0x2a7   : > { %v1375_v30 = vsub.f32 0.0, %v1372_v39 }
 0x2a9   : > { %1377 = vst.msk [vmem:[%s247_s23] sm:$0x1] %vm1376_vm12, %v1375_v30 }
 0x2aa PF: > { %s18_s16 = sadd.s32 1, %s1742_s16   ;;  %s2904_s9 = smov %s1718_s10 }
 0x2ab   : > { %p15_p3 = scmp.ge.s32.totalorder %s18_s16, 10   ;;  %s2905_s10 = smov %s1722_s11 }
 0x2ac   : > { %s2906_s11 = smov %s1832_s26  ;;  %s2907_s12 = smov %s1734_s14 }
 0x2ad   : > { %s2908_s13 = smov %s1738_s15  ;;  %s2909_s14 = smov %s2912_s17 }
 0x2ae   : > { %s2910_s15 = smov %s2916_s18  ;;  %17 = sbr.rel (!%p15_p3) target bundleno = 7 (0x7), region = 90 }
 0x2b3   :  { %1395 = vsyncpa [#allocation5], 1 }
 0x2b4   :  { %1397 = vsyncpa [#allocation5 + $0x1], 1 }
 0x2b5   :  { %1398 = vsyncpa [#allocation7], 1 }
 0x2b6   :  { %1400 = vsyncpa [#allocation7 + $0x1], 1 }

</bundles_post_ra>
